<compile_context>
chip_gen: v6e
topology: v6e:2x2x1
jax: 0.10.0
libtpu: 0.0.40
codegen_flags: <defaults>
</compile_context>

<pallas_src>
import jax
import jax.numpy as jnp
from jax.experimental import pallas as pl
from jax.experimental.pallas import tpu as pltpu

IN_FEATURES = 8
HIDDEN = 8
OUT_FEATURES = 5
LEAKY_SLOPE = 0.01          # nn.LeakyReLU default

PACK = 16                   # original rows packed per lane-dense row
LANES = PACK * IN_FEATURES  # 128
MAX_BLOCK_PACKED = 2048     # 2048 packed rows = 32768 original rows per grid step


def _leaky(x):
    return jnp.where(x > 0, x, LEAKY_SLOPE * x)


def num_decoder_kernel(x_ref, w1_ref, b1_ref, w2_ref, b2_ref, w3_ref, b3_ref,
                       out_ref):
    f32 = jnp.float32
    hi = jax.lax.Precision.HIGHEST

    # layer 1: Linear(8,8) + LeakyReLU (block-diagonal 128x128 weight)
    h = _leaky(jnp.dot(x_ref[...], w1_ref[...],
                       preferred_element_type=f32, precision=hi) + b1_ref[...])
    # layer 2: Linear(8,8) + LeakyReLU
    h = _leaky(jnp.dot(h, w2_ref[...],
                       preferred_element_type=f32, precision=hi) + b2_ref[...])
    # layer 3: Linear(8,5) (zero-padded to 8 outputs per packed slot), no activation
    out_ref[...] = (jnp.dot(h, w3_ref[...],
                            preferred_element_type=f32, precision=hi)
                    + b3_ref[...])


def init_params(key):
    """PyTorch-style nn.Linear init; weights stored pre-transposed as [in, out]."""
    def lin(k, din, dout):
        kw, kb = jax.random.split(k)
        bound = 1.0 / jnp.sqrt(jnp.float32(din))
        w = jax.random.uniform(kw, (din, dout), jnp.float32, -bound, bound)
        b = jax.random.uniform(kb, (1, dout), jnp.float32, -bound, bound)
        return w, b

    k1, k2, k3 = jax.random.split(key, 3)
    p = {}
    p["w1"], p["b1"] = lin(k1, IN_FEATURES, HIDDEN)
    p["w2"], p["b2"] = lin(k2, HIDDEN, HIDDEN)
    p["w3"], p["b3"] = lin(k3, HIDDEN, OUT_FEATURES)
    return p


def _pack_params(params):
    """Build lane-dense 128x128 block-diagonal weights and (1,128) tiled biases."""
    eye = jnp.eye(PACK, dtype=jnp.float32)
    w1 = jnp.kron(eye, params["w1"])                                   # (128,128)
    w2 = jnp.kron(eye, params["w2"])                                   # (128,128)
    w3p = jnp.pad(params["w3"], ((0, 0), (0, HIDDEN - OUT_FEATURES)))  # (8,8)
    w3 = jnp.kron(eye, w3p)                                            # (128,128)
    b1 = jnp.tile(params["b1"], (1, PACK))                             # (1,128)
    b2 = jnp.tile(params["b2"], (1, PACK))
    b3p = jnp.pad(params["b3"], ((0, 0), (0, HIDDEN - OUT_FEATURES)))
    b3 = jnp.tile(b3p, (1, PACK))
    return w1, b1, w2, b2, w3, b3


def _choose_block_packed(packed_n):
    """>= 2 grid steps when possible (v7x megacore), sublane-aligned, VMEM-capped."""
    if packed_n <= 16:
        return packed_n                       # single full-extent block (always legal)
    half = -(-packed_n // 2)                  # cdiv(packed_n, 2)
    half = -(-half // 8) * 8                  # round up to sublane multiple of 8
    return min(MAX_BLOCK_PACKED, half)


@jax.jit
def num_decoder_forward(x, params):
    n, k = x.shape
    assert k == IN_FEATURES, f"expected {IN_FEATURES} input features, got {k}"

    # Pad only up to a multiple of PACK (<= 15 rows) so the lane-dense reshape works.
    n16 = -(-n // PACK) * PACK
    if n16 != n:
        x = jnp.pad(x, ((0, n16 - n), (0, 0)))
    packed_n = n16 // PACK
    x_packed = x.reshape(packed_n, LANES)     # free row-major reshape, stays f32

    w1, b1, w2, b2, w3, b3 = _pack_params(params)

    block = _choose_block_packed(packed_n)
    grid = (-(-packed_n // block),)           # non-divisible tail handled by masking

    def resident(arr):
        # Whole (tiny) array, same block every grid step -> DMA'd once, VMEM-resident.
        return pl.BlockSpec(arr.shape, lambda i: (0, 0))

    out_packed = pl.pallas_call(
        num_decoder_kernel,
        out_shape=jax.ShapeDtypeStruct((packed_n, LANES), jnp.float32),
        grid_spec=pltpu.PrefetchScalarGridSpec(
            num_scalar_prefetch=0,
            grid=grid,
            in_specs=[
                pl.BlockSpec((block, LANES), lambda i: (i, 0)),
                resident(w1), resident(b1),
                resident(w2), resident(b2),
                resident(w3), resident(b3),
            ],
            out_specs=pl.BlockSpec((block, LANES), lambda i: (i, 0)),
        ),
        compiler_params=pltpu.CompilerParams(
            dimension_semantics=("parallel",),
            vmem_limit_bytes=32 * 1024 * 1024,
        ),
    )(x_packed, w1, b1, w2, b2, w3, b3)

    # Unpack lane-dense output back to (rows, 8), drop the 3 zero-pad columns and
    # any padded rows. Padded/garbage rows are never used beyond this slice.
    return out_packed.reshape(n16, HIDDEN)[:n, :OUT_FEATURES]


def num_decoder_reference(x, params):
    """Pure-JAX f32 reference for correctness checking."""
    hi = jax.lax.Precision.HIGHEST
    h = _leaky(jnp.dot(x, params["w1"], precision=hi) + params["b1"])
    h = _leaky(jnp.dot(h, params["w2"], precision=hi) + params["b2"])
    return jnp.dot(h, params["w3"], precision=hi) + params["b3"]


if __name__ == "__main__":
    # N deliberately not a multiple of 16: exercises the pack padding, a multi-step
    # grid (packed_n=63, block=32 -> 2 steps) and the masked partial final block.
    N = 1000

    key = jax.random.PRNGKey(0)
    kx, kp = jax.random.split(key)
    x = jax.random.normal(kx, (N, IN_FEATURES), jnp.float32)
    params = init_params(kp)

    out = num_decoder_forward(x, params)
    out = jax.block_until_ready(out)

    ref = num_decoder_reference(x, params)
    assert out.shape == (N, OUT_FEATURES)
    max_diff = float(jnp.max(jnp.abs(out - ref)))
    assert jnp.allclose(out, ref, atol=1e-4, rtol=1e-4), (
        f"mismatch vs pure-JAX reference; max abs diff = {max_diff}")

    print("KERNEL_OK")
</pallas_src>

<mosaic_0001>
module attributes {stable_mosaic.version = 11 : i64} {
  func.func @num_decoder_kernel(%arg0: i32, %arg1: memref<32x128xf32, #tpu.memory_space<vmem>>, %arg2: memref<128x128xf32, #tpu.memory_space<vmem>>, %arg3: memref<1x128xf32, #tpu.memory_space<vmem>>, %arg4: memref<128x128xf32, #tpu.memory_space<vmem>>, %arg5: memref<1x128xf32, #tpu.memory_space<vmem>>, %arg6: memref<128x128xf32, #tpu.memory_space<vmem>>, %arg7: memref<1x128xf32, #tpu.memory_space<vmem>>, %arg8: memref<32x128xf32, #tpu.memory_space<vmem>>) attributes {dimension_semantics = [#tpu.dimension_semantics<parallel>], iteration_bounds = array<i64: 2>, scalar_prefetch = 0 : i64, scratch_operands = 0 : i64, tpu.core_type = #tpu.core_type<tc>, window_params = [{transform_indices = @transform_0, window_bounds = array<i64: 32, 128>}, {pipeline_mode = #tpu.pipeline_mode<synchronous>, transform_indices = @transform_1, window_bounds = array<i64: 128, 128>}, {pipeline_mode = #tpu.pipeline_mode<synchronous>, transform_indices = @transform_2, window_bounds = array<i64: 1, 128>}, {pipeline_mode = #tpu.pipeline_mode<synchronous>, transform_indices = @transform_3, window_bounds = array<i64: 128, 128>}, {pipeline_mode = #tpu.pipeline_mode<synchronous>, transform_indices = @transform_4, window_bounds = array<i64: 1, 128>}, {pipeline_mode = #tpu.pipeline_mode<synchronous>, transform_indices = @transform_5, window_bounds = array<i64: 128, 128>}, {pipeline_mode = #tpu.pipeline_mode<synchronous>, transform_indices = @transform_6, window_bounds = array<i64: 1, 128>}, {transform_indices = @transform_7, window_bounds = array<i64: 32, 128>}]} {
    %c0 = arith.constant 0 : index
    %c0_0 = arith.constant 0 : index
    %0 = vector.load %arg1[%c0, %c0_0] : memref<32x128xf32, #tpu.memory_space<vmem>>, vector<32x128xf32>
    %c0_1 = arith.constant 0 : index
    %c0_2 = arith.constant 0 : index
    %1 = vector.load %arg2[%c0_1, %c0_2] : memref<128x128xf32, #tpu.memory_space<vmem>>, vector<128x128xf32>
    %cst = arith.constant dense<0.000000e+00> : vector<32x128xf32>
    %2 = tpu.matmul %0, %1, %cst {dimension_numbers = #tpu.dot_dimension_numbers<[1], [0], [0], [1], [0, 0, 1, 1], [], []>, precision = #tpu.contract_precision<fp32>} : vector<32x128xf32>, vector<128x128xf32>, vector<32x128xf32> -> vector<32x128xf32>
    %c0_3 = arith.constant 0 : index
    %c0_4 = arith.constant 0 : index
    %3 = vector.load %arg3[%c0_3, %c0_4] : memref<1x128xf32, #tpu.memory_space<vmem>>, vector<1x128xf32>
    %4 = vector.broadcast %3 : vector<1x128xf32> to vector<32x128xf32>
    %5 = arith.addf %2, %4 : vector<32x128xf32>
    %cst_5 = arith.constant 0.000000e+00 : f32
    %6 = vector.broadcast %cst_5 : f32 to vector<32x128xf32>
    %7 = arith.cmpf ogt, %5, %6 : vector<32x128xf32>
    %cst_6 = arith.constant 0.00999999977 : f32
    %8 = vector.broadcast %cst_6 : f32 to vector<32x128xf32>
    %9 = arith.mulf %8, %5 : vector<32x128xf32>
    %10 = arith.select %7, %5, %9 : vector<32x128xi1>, vector<32x128xf32>
    %c0_7 = arith.constant 0 : index
    %c0_8 = arith.constant 0 : index
    %11 = vector.load %arg4[%c0_7, %c0_8] : memref<128x128xf32, #tpu.memory_space<vmem>>, vector<128x128xf32>
    %cst_9 = arith.constant dense<0.000000e+00> : vector<32x128xf32>
    %12 = tpu.matmul %10, %11, %cst_9 {dimension_numbers = #tpu.dot_dimension_numbers<[1], [0], [0], [1], [0, 0, 1, 1], [], []>, precision = #tpu.contract_precision<fp32>} : vector<32x128xf32>, vector<128x128xf32>, vector<32x128xf32> -> vector<32x128xf32>
    %c0_10 = arith.constant 0 : index
    %c0_11 = arith.constant 0 : index
    %13 = vector.load %arg5[%c0_10, %c0_11] : memref<1x128xf32, #tpu.memory_space<vmem>>, vector<1x128xf32>
    %14 = vector.broadcast %13 : vector<1x128xf32> to vector<32x128xf32>
    %15 = arith.addf %12, %14 : vector<32x128xf32>
    %cst_12 = arith.constant 0.000000e+00 : f32
    %16 = vector.broadcast %cst_12 : f32 to vector<32x128xf32>
    %17 = arith.cmpf ogt, %15, %16 : vector<32x128xf32>
    %cst_13 = arith.constant 0.00999999977 : f32
    %18 = vector.broadcast %cst_13 : f32 to vector<32x128xf32>
    %19 = arith.mulf %18, %15 : vector<32x128xf32>
    %20 = arith.select %17, %15, %19 : vector<32x128xi1>, vector<32x128xf32>
    %c0_14 = arith.constant 0 : index
    %c0_15 = arith.constant 0 : index
    %21 = vector.load %arg6[%c0_14, %c0_15] : memref<128x128xf32, #tpu.memory_space<vmem>>, vector<128x128xf32>
    %cst_16 = arith.constant dense<0.000000e+00> : vector<32x128xf32>
    %22 = tpu.matmul %20, %21, %cst_16 {dimension_numbers = #tpu.dot_dimension_numbers<[1], [0], [0], [1], [0, 0, 1, 1], [], []>, precision = #tpu.contract_precision<fp32>} : vector<32x128xf32>, vector<128x128xf32>, vector<32x128xf32> -> vector<32x128xf32>
    %c0_17 = arith.constant 0 : index
    %c0_18 = arith.constant 0 : index
    %23 = vector.load %arg7[%c0_17, %c0_18] : memref<1x128xf32, #tpu.memory_space<vmem>>, vector<1x128xf32>
    %24 = vector.broadcast %23 : vector<1x128xf32> to vector<32x128xf32>
    %25 = arith.addf %22, %24 : vector<32x128xf32>
    %c0_19 = arith.constant 0 : index
    %c0_20 = arith.constant 0 : index
    %26 = vector.load %arg8[%c0_19, %c0_20] : memref<32x128xf32, #tpu.memory_space<vmem>>, vector<32x128xf32>
    tpu.vector_store %arg8[%c0_19, %c0_20], %25 {strides = array<i32>} : memref<32x128xf32, #tpu.memory_space<vmem>>, vector<32x128xf32>,
    return
  }
  func.func @transform_0(%arg0: i32) -> (i32, i32) {
    %c0_i32 = arith.constant 0 : i32
    %c0_i32_0 = arith.constant 0 : i32
    return %arg0, %c0_i32 : i32, i32
  }
  func.func @transform_1(%arg0: i32) -> (i32, i32) {
    %c0_i32 = arith.constant 0 : i32
    %c0_i32_0 = arith.constant 0 : i32
    %c0_i32_1 = arith.constant 0 : i32
    return %c0_i32, %c0_i32_0 : i32, i32
  }
  func.func @transform_2(%arg0: i32) -> (i32, i32) {
    %c0_i32 = arith.constant 0 : i32
    %c0_i32_0 = arith.constant 0 : i32
    %c0_i32_1 = arith.constant 0 : i32
    return %c0_i32, %c0_i32_0 : i32, i32
  }
  func.func @transform_3(%arg0: i32) -> (i32, i32) {
    %c0_i32 = arith.constant 0 : i32
    %c0_i32_0 = arith.constant 0 : i32
    %c0_i32_1 = arith.constant 0 : i32
    return %c0_i32, %c0_i32_0 : i32, i32
  }
  func.func @transform_4(%arg0: i32) -> (i32, i32) {
    %c0_i32 = arith.constant 0 : i32
    %c0_i32_0 = arith.constant 0 : i32
    %c0_i32_1 = arith.constant 0 : i32
    return %c0_i32, %c0_i32_0 : i32, i32
  }
  func.func @transform_5(%arg0: i32) -> (i32, i32) {
    %c0_i32 = arith.constant 0 : i32
    %c0_i32_0 = arith.constant 0 : i32
    %c0_i32_1 = arith.constant 0 : i32
    return %c0_i32, %c0_i32_0 : i32, i32
  }
  func.func @transform_6(%arg0: i32) -> (i32, i32) {
    %c0_i32 = arith.constant 0 : i32
    %c0_i32_0 = arith.constant 0 : i32
    %c0_i32_1 = arith.constant 0 : i32
    return %c0_i32, %c0_i32_0 : i32, i32
  }
  func.func @transform_7(%arg0: i32) -> (i32, i32) {
    %c0_i32 = arith.constant 0 : i32
    %c0_i32_0 = arith.constant 0 : i32
    return %arg0, %c0_i32 : i32, i32
  }
}

</mosaic_0001>

<bundles_post_ra>
// kernel: num_decoder_forward.1
= control target key start
LH: loop header
LB: loop body
LE: loop exit
PB: predicated region body
PF: predicated region fallthrough
CT: control target
= control target key end

     0   :  { %s3863_s24 = smov 0   ;;  %s5168_s0 = inlined_call_operand.vmem [shape: f32[63,128], index: 0, kind: input, shape index: {}]   ;;  %s5169_s1 = inlined_call_operand.vmem [shape: f32[128,128], index: 1, kind: input, shape index: {}]   ;;  %s5170_s2 = inlined_call_operand.vmem [shape: f32[1,128], index: 2, kind: input, shape index: {}]   ;;  %s5171_s3 = inlined_call_operand.vmem [shape: f32[128,128], index: 3, kind: input, shape index: {}]   ;;  %s5172_s4 = inlined_call_operand.vmem [shape: f32[1,128], index: 4, kind: input, shape index: {}]   ;;  %s5173_s5 = inlined_call_operand.vmem [shape: f32[128,128], index: 5, kind: input, shape index: {}]   ;;  %s5174_s6 = inlined_call_operand.vmem [shape: f32[1,128], index: 6, kind: input, shape index: {}]   ;;  %s5175_s7 = inlined_call_operand.vmem [shape: f32[63,128], index: 7, kind: output, shape index: {}]  }
   0x1 LB: > { %s2749_s25 = sadd.s32 4294967295, %s3821_s24   ;;  %p2753_p0 = scmp.ge.s32.totalorder %s3821_s24, 1  ;;  %s3821_s24 = sphi %s3863_s24, %s17_s24  }
   0x2   : > { %p238_p1 = scmp.lt.s32.totalorder %s3821_s24, 3 }
   0x4   : > { %p239_p2 = pnand %p2753_p0, %p238_p1 }
   0x6   : > { %242 = sbr.rel (%p239_p2) target bundleno = 894 (0x37e), region = 48 }
   0xb   : > { %v301_v0 = vld [vmem:[%s5169_s1 + $0x78] sm:$0xff]  ;;  %v300_v1 = vld [vmem:[%s5169_s1 + $0x70] sm:$0xff]  ;;  %v299_v2 = vld [vmem:[%s5169_s1 + $0x68] sm:$0xff]  ;;  %s2754_s9 = sshll.u32 %s2749_s25, 2 }
   0xc   : > { %v3880_v3 = vand.u32 4294901760, %v301_v0  ;;  %v3882_v4 = vand.u32 4294901760, %v300_v1  ;;  %v3884_v5 = vand.u32 4294901760, %v299_v2  ;;  %v298_v6 = vld [vmem:[%s5169_s1 + $0x60] sm:$0xff]  ;;  %v297_v7 = vld [vmem:[%s5169_s1 + $0x58] sm:$0xff]  ;;  %v296_v8 = vld [vmem:[%s5169_s1 + $0x50] sm:$0xff] }
   0xd   : > { %v3895_v9 = vand.u32 4294901760, %v298_v6  ;;  %v3897_v10 = vand.u32 4294901760, %v297_v7  ;;  %v3899_v11 = vand.u32 4294901760, %v296_v8  ;;  %v295_v12 = vld [vmem:[%s5169_s1 + $0x48] sm:$0xff]  ;;  %v294_v13 = vld [vmem:[%s5169_s1 + $0x40] sm:$0xff]  ;;  %v293_v18 = vld [vmem:[%s5169_s1 + $0x38] sm:$0xff] }
   0xe   : > { %3123 = vmatprep.subr.mxu0 %v3880_v3  ;;  %v3909_v14 = vsub.f32 %v301_v0, %v3880_v3  ;;  %v3912_v15 = vsub.f32 %v300_v1, %v3882_v4  ;;  %v3914_v16 = vand.u32 4294901760, %v295_v12  ;;  %v3917_v17 = vsub.f32 %v299_v2, %v3884_v5  ;;  %p271_p3 = scmp.lt.s32.totalorder %s2754_s9, 7  ;;  %v292_v25 = vld [vmem:[%s5169_s1 + $0x30] sm:$0xff]  ;;  %v291_v35 = vld [vmem:[%s5169_s1 + $0x28] sm:$0xff]  ;;  %v290_v40 = vld [vmem:[%s5169_s1 + $0x20] sm:$0xff] }
   0xf   : > { %3124 = vmatpush3.msra.mxu0 %v3880_v3  ;;  %v3924_v19 = vsub.f32 %v298_v6, %v3895_v9  ;;  %v3927_v20 = vsub.f32 %v297_v7, %v3897_v10  ;;  %v3939_v24 = vand.u32 4294901760, %v294_v13  ;;  %v3950_v27 = vand.u32 4294901760, %v293_v18  ;;  %v289_v48 = vld [vmem:[%s5169_s1 + $0x18] sm:$0xff]  ;;  %v288_v59 = vld [vmem:[%s5169_s1 + $0x10] sm:$0xff]  ;;  %v287_v2 = vld [vmem:[%s5169_s1 + $0x8] sm:$0xff] }
  0x10   : > { %3125 = vmatprep.subr.mxu0 %v3882_v4  ;;  %v3931_v21 = vand.u32 4294901760, %v3909_v14  ;;  %v3934_v22 = vand.u32 4294901760, %v3912_v15  ;;  %v3937_v23 = vand.u32 4294901760, %v3917_v17  ;;  %s5337_s9 = smov (!%p271_p3, %s2754_s9), 7  ;;  %v3956_v29 = vsub.f32 %v296_v8, %v3899_v11 }
  0x11   : > { %3126 = vmatpush3.msra.mxu0 %v3882_v4  ;;  %v3948_v26 = vand.u32 4294901760, %v3924_v19  ;;  %v3953_v28 = vand.u32 4294901760, %v3927_v20  ;;  %v3966_v33 = vsub.f32 %v295_v12, %v3914_v16  ;;  %s2755_s25 = sshll.u32 %s5337_s9, 3  ;;  %v3970_v34 = vand.u32 4294901760, %v292_v25 }
  0x12   : > { %3127 = vmatprep.subr.mxu0 %v3884_v5  ;;  %v434_v30 = vsub.f32 %v3909_v14, %v3931_v21  ;;  %v441_v31 = vsub.f32 %v3912_v15, %v3934_v22  ;;  %v448_v32 = vsub.f32 %v3917_v17, %v3937_v23  ;;  %v3979_v39 = vand.u32 4294901760, %v3956_v29  ;;  %s3989_s10 = scalar_lea.vmem %s5168_s0, %s2755_s25  ;;  %s280_s11 = scalar_lea.vmem %s5175_s7, %s2755_s25 }
  0x13   : > { %3128 = vmatpush3.msra.mxu0 %v3884_v5  ;;  %v455_v38 = vsub.f32 %v3924_v19, %v3948_v26  ;;  %v462_v41 = vsub.f32 %v3927_v20, %v3953_v28  ;;  %v3995_v42 = vand.u32 4294901760, %v3966_v33  ;;  %v3998_v43 = vsub.f32 %v294_v13, %v3939_v24  ;;  %v282_v49 = vld [vmem:[%s3989_s10] sm:$0xff]  ;;  %v283_v54 = vld [vmem:[%s3989_s10 + $0x8] sm:$0xff] }
  0x14   : > { %3129 = vmatprep.subr.mxu0 %v3895_v9  ;;  %v435_v36 = vand.u32 4294901760, %v434_v30  ;;  %v442_v37 = vand.u32 4294901760, %v441_v31  ;;  %v449_v44 = vand.u32 4294901760, %v448_v32  ;;  %v4001_v45 = vand.u32 4294901760, %v291_v35 }
  0x15   : > { %3130 = vmatpush3.msra.mxu0 %v3895_v9  ;;  %v4004_v46 = vsub.f32 %v293_v18, %v3950_v27  ;;  %v4007_v47 = vand.u32 4294901760, %v290_v40  ;;  %v456_v50 = vand.u32 4294901760, %v455_v38  ;;  %v469_v51 = vsub.f32 %v3956_v29, %v3979_v39  ;;  %v286_v18 = vld [vmem:[%s5169_s1] sm:$0xff] }
  0x16   : > { %3131 = vmatprep.subr.mxu0 %v3897_v10  ;;  %3161 = vmatprep.subr.mxu1 %v435_v36  ;;  %v4017_v52 = vand.u32 4294901760, %v3998_v43  ;;  %v4020_v53 = vsub.f32 %v292_v25, %v3970_v34  ;;  %v463_v55 = vand.u32 4294901760, %v462_v41  ;;  %v476_v56 = vsub.f32 %v3966_v33, %v3995_v42 }
  0x17   : > { %3132 = vmatpush3.msra.mxu0 %v3897_v10  ;;  %3162 = vmatpush3.msra.mxu1 %v435_v36  ;;  %v4027_v57 = vand.u32 4294901760, %v289_v48  ;;  %v4030_v58 = vand.u32 4294901760, %v4004_v46  ;;  %v4036_v60 = vsub.f32 %v291_v35, %v4001_v45  ;;  %v4038_v61 = vand.u32 4294901760, %v282_v49 }
  0x18   : > { %3133 = vmatprep.subr.mxu0 %v3899_v11  ;;  %3163 = vmatprep.subr.mxu1 %v442_v37  ;;  %v4041_v62 = vand.u32 4294901760, %v283_v54  ;;  %v470_v63 = vand.u32 4294901760, %v469_v51  ;;  %v483_v0 = vsub.f32 %v3998_v43, %v4017_v52  ;;  %v4047_v1 = vand.u32 4294901760, %v4020_v53 }
  0x19   : > { %3134 = vmatpush3.msra.mxu0 %v3899_v11  ;;  %3164 = vmatpush3.msra.mxu1 %v442_v37  ;;  %v4053_v6 = vsub.f32 %v290_v40, %v4007_v47  ;;  %v477_v7 = vand.u32 4294901760, %v476_v56  ;;  %v4056_v8 = vand.u32 4294901760, %v288_v59  ;;  %v490_v12 = vsub.f32 %v4004_v46, %v4030_v58 }
  0x1a   : > { %3135 = vmatprep.subr.mxu0 %v3914_v16  ;;  %3165 = vmatprep.subr.mxu1 %v449_v44  ;;  %v4062_v13 = vand.u32 4294901760, %v4036_v60  ;;  %v4068_v25 = vsub.f32 %v282_v49, %v4038_v61  ;;  %v4071_v30 = vsub.f32 %v289_v48, %v4027_v57  ;;  %v4074_v31 = vand.u32 4294901760, %v287_v2 }
  0x1b   : > { %3136 = vmatpush3.msra.mxu0 %v3914_v16  ;;  %3166 = vmatpush3.msra.mxu1 %v449_v44  ;;  %v4077_v32 = vsub.f32 %v283_v54, %v4041_v62  ;;  %v484_v35 = vand.u32 4294901760, %v483_v0  ;;  %v497_v36 = vsub.f32 %v4020_v53, %v4047_v1  ;;  %v4083_v37 = vand.u32 4294901760, %v4053_v6 }
  0x1c   : > { %3137 = vmatprep.subr.mxu0 %v3939_v24  ;;  %3167 = vmatprep.subr.mxu1 %v456_v50  ;;  %v4086_v38 = vand.u32 4294901760, %v286_v18  ;;  %v4089_v40 = vsub.f32 %v288_v59, %v4056_v8  ;;  %v491_v41 = vand.u32 4294901760, %v490_v12  ;;  %v504_v44 = vsub.f32 %v4036_v60, %v4062_v13 }
  0x1d   : > { %3138 = vmatpush3.msra.mxu0 %v3939_v24  ;;  %3168 = vmatpush3.msra.mxu1 %v456_v50  ;;  %v5177_v48 = vand.u32 4294901760, %v4068_v25  ;;  %v4096_v49 = vand.u32 4294901760, %v4071_v30  ;;  %v5176_v50 = vand.u32 4294901760, %v4077_v32  ;;  %v4101_v51 = vsub.f32 %v287_v2, %v4074_v31 }
  0x1e   : > { %3139 = vmatprep.subr.mxu0 %v3950_v27  ;;  %3169 = vmatprep.subr.mxu1 %v463_v55  ;;  %v498_v54 = vand.u32 4294901760, %v497_v36  ;;  %v4108_v56 = vand.u32 4294901760, %v4089_v40  ;;  %v4111_v59 = vsub.f32 %v286_v18, %v4086_v38 }
  0x1f   : > { %3140 = vmatpush3.msra.mxu0 %v3950_v27  ;;  %3170 = vmatpush3.msra.mxu1 %v463_v55  ;;  %v511_v55 = vsub.f32 %v4053_v6, %v4083_v37  ;;  %v393_v0 = vsub.f32 %v4068_v25, %v5177_v48  ;;  %v518_v2 = vsub.f32 %v4071_v30, %v4096_v49  ;;  %v4124_v12 = vand.u32 4294901760, %v4101_v51 }
  0x20   : > { %3141 = vmatprep.subr.mxu0 %v3970_v34  ;;  %3171 = vmatprep.subr.mxu1 %v470_v63  ;;  %v4131_v36 = vand.u32 4294901760, %v4111_v59 }
  0x21   : > { %3142 = vmatpush3.msra.mxu0 %v3970_v34  ;;  %3172 = vmatpush3.msra.mxu1 %v470_v63  ;;  %v505_v63 = vand.u32 4294901760, %v504_v44  ;;  %v512_v18 = vand.u32 4294901760, %v511_v55  ;;  %v519_v44 = vand.u32 4294901760, %v518_v2  ;;  %v532_v55 = vsub.f32 %v4101_v51, %v4124_v12  ;;  %v284_v2 = vld [vmem:[%s3989_s10 + $0x10] sm:$0xff] }
  0x22   : > { %3143 = vmatprep.subr.mxu0 %v4001_v45  ;;  %3173 = vmatprep.subr.mxu1 %v477_v7  ;;  %v539_v48 = vsub.f32 %v4111_v59, %v4131_v36 }
  0x23   : > { %3144 = vmatpush3.msra.mxu0 %v4001_v45  ;;  %3174 = vmatpush3.msra.mxu1 %v477_v7  ;;  %v403_v7 = vsub.f32 %v4077_v32, %v5176_v50 }
  0x24   : > { %3145 = vmatprep.subr.mxu0 %v4007_v47  ;;  %3175 = vmatprep.subr.mxu1 %v484_v35 }
  0x25   : > { %3146 = vmatpush3.msra.mxu0 %v4007_v47  ;;  %3176 = vmatpush3.msra.mxu1 %v484_v35  ;;  %v525_v35 = vsub.f32 %v4089_v40, %v4108_v56  ;;  %v404_v50 = vand.u32 4294901760, %v403_v7 }
  0x26   : > { %3147 = vmatprep.subr.mxu0 %v4027_v57  ;;  %3177 = vmatprep.subr.mxu1 %v491_v41 }
  0x27   : > { %3148 = vmatpush3.msra.mxu0 %v4027_v57  ;;  %3178 = vmatpush3.msra.mxu1 %v491_v41  ;;  %v394_v41 = vand.u32 4294901760, %v393_v0  ;;  %v540_v0 = vand.u32 4294901760, %v539_v48 }
  0x28   : > { %3149 = vmatprep.subr.mxu0 %v4056_v8  ;;  %3179 = vmatprep.subr.mxu1 %v498_v54 }
  0x29   : > { %3150 = vmatpush3.msra.mxu0 %v4056_v8  ;;  %3180 = vmatpush3.msra.mxu1 %v498_v54  ;;  %v526_v54 = vand.u32 4294901760, %v525_v35  ;;  %v1098_v35 = vld [vmem:[%s5171_s3 + $0x38] sm:$0xff] }
  0x2a   : > { %3151 = vmatprep.subr.mxu0 %v4074_v31  ;;  %3181 = vmatprep.subr.mxu1 %v505_v63 }
  0x2b   : > { %3152 = vmatpush3.msra.mxu0 %v4074_v31  ;;  %3182 = vmatpush3.msra.mxu1 %v505_v63  ;;  %v533_v63 = vand.u32 4294901760, %v532_v55  ;;  %v1097_v55 = vld [vmem:[%s5171_s3 + $0x30] sm:$0xff] }
  0x2c   : > { %3153 = vmatprep.subr.mxu0 %v4086_v38  ;;  %3183 = vmatprep.subr.mxu1 %v512_v18 }
  0x2d   : > { %3154 = vmatpush3.msra.mxu0 %v4086_v38  ;;  %3184 = vmatpush3.msra.mxu1 %v512_v18 }
  0x2e   : > { %3155 = vmatprep.mubr.f32.mxu0 %v394_v41  ;;  %3185 = vmatprep.subr.mxu1 %v519_v44 }
  0x2f   : > { %3199 = vmatprep.subr.mxu0 %v3909_v14  ;;  %3156 = vmatmul.mubr.f32.vlgmr.msra.gmra.mxu0 %v404_v50  ;;  %v285_v50 = vld [vmem:[%s3989_s10 + $0x18] sm:$0xff] }
  0x30   : > { %3186 = vmatpush3.msra.mxu1 %v519_v44  ;;  %3200 = vmatpush3.msra.mxu0 %v3909_v14  ;;  %v4153_v14 = vand.u32 4294901760, %v284_v2  ;;  %v4429_v44 = vand.u32 4294901760, %v1098_v35 }
  0x31   : > { %3187 = vmatprep.subr.mxu1 %v526_v54  ;;  %3201 = vmatprep.subr.mxu0 %v3912_v15 }
  0x32   : > { %3188 = vmatpush3.msra.mxu1 %v526_v54  ;;  %3202 = vmatpush3.msra.mxu0 %v3912_v15  ;;  %v4157_v15 = vand.u32 4294901760, %v285_v50 }
  0x33   : > { %3189 = vmatprep.subr.mxu1 %v533_v63  ;;  %3203 = vmatprep.subr.mxu0 %v3917_v17 }
  0x34   : > { %3190 = vmatpush3.msra.mxu1 %v533_v63  ;;  %3204 = vmatpush3.msra.mxu0 %v3917_v17  ;;  %v4166_v17 = vsub.f32 %v284_v2, %v4153_v14  ;;  %v4442_v2 = vand.u32 4294901760, %v1097_v55 }
  0x35   : > { %3191 = vmatprep.subr.mxu1 %v540_v0  ;;  %3205 = vmatprep.subr.mxu0 %v3924_v19 }
  0x36   : > { %3192 = vmatpush3.msra.mxu1 %v540_v0  ;;  %3193 = vmatprep.mubr.f32.mxu1 %v4038_v61  ;;  %v4440_v0 = vsub.f32 %v1098_v35, %v4429_v44 }
  0x37   : > { %3206 = vmatpush3.msra.mxu0 %v3924_v19  ;;  %3194 = vmatmul.mubr.f32.vlgmr.msra.gmra.mxu1 %v4041_v62  ;;  %v4171_v19 = vsub.f32 %v285_v50, %v4157_v15  ;;  %v1096_v50 = vld [vmem:[%s5171_s3 + $0x28] sm:$0xff] }
  0x38   : > { %3207 = vmatprep.subr.mxu0 %v3927_v20  ;;  %3237 = vmatprep.subr.mxu1 %v3880_v3 }
  0x39   : > { %3208 = vmatpush3.msra.mxu0 %v3927_v20  ;;  %3238 = vmatpush3.msra.mxu1 %v3880_v3  ;;  %v412_v20 = vand.u32 4294901760, %v4166_v17 }
  0x3a   : > { %3209 = vmatprep.subr.mxu0 %v3956_v29  ;;  %3239 = vmatprep.subr.mxu1 %v3882_v4 }
  0x3b   : > { %3210 = vmatpush3.msra.mxu0 %v3956_v29  ;;  %3240 = vmatpush3.msra.mxu1 %v3882_v4  ;;  %v422_v29 = vand.u32 4294901760, %v4171_v19 }
  0x3c   : > { %3211 = vmatprep.subr.mxu0 %v3966_v33  ;;  %3241 = vmatprep.subr.mxu1 %v3884_v5 }
  0x3d   : > { %3212 = vmatpush3.msra.mxu0 %v3966_v33  ;;  %3242 = vmatpush3.msra.mxu1 %v3884_v5  ;;  %v413_v33 = vsub.f32 %v4166_v17, %v412_v20 }
  0x3e   : > { %3213 = vmatprep.subr.mxu0 %v3998_v43  ;;  %3243 = vmatprep.subr.mxu1 %v3895_v9 }
  0x3f   : > { %3214 = vmatpush3.msra.mxu0 %v3998_v43  ;;  %3244 = vmatpush3.msra.mxu1 %v3895_v9  ;;  %v423_v43 = vsub.f32 %v4171_v19, %v422_v29 }
  0x40   : > { %3215 = vmatprep.subr.mxu0 %v4004_v46  ;;  %3245 = vmatprep.subr.mxu1 %v3897_v10 }
  0x41   : > { %3216 = vmatpush3.msra.mxu0 %v4004_v46  ;;  %3246 = vmatpush3.msra.mxu1 %v3897_v10  ;;  %v414_v46 = vand.u32 4294901760, %v413_v33 }
  0x42   : > { %3217 = vmatprep.subr.mxu0 %v4020_v53  ;;  %3247 = vmatprep.subr.mxu1 %v3899_v11 }
  0x43   : > { %3218 = vmatpush3.msra.mxu0 %v4020_v53  ;;  %3248 = vmatpush3.msra.mxu1 %v3899_v11  ;;  %v424_v53 = vand.u32 4294901760, %v423_v43 }
  0x44   : > { %3219 = vmatprep.subr.mxu0 %v4036_v60  ;;  %3249 = vmatprep.subr.mxu1 %v3914_v16 }
  0x45   : > { %3220 = vmatpush3.msra.mxu0 %v4036_v60  ;;  %3250 = vmatpush3.msra.mxu1 %v3914_v16 }
  0x46   : > { %3221 = vmatprep.subr.mxu0 %v4053_v6  ;;  %3251 = vmatprep.subr.mxu1 %v3939_v24 }
  0x47   : > { %3222 = vmatpush3.msra.mxu0 %v4053_v6  ;;  %3252 = vmatpush3.msra.mxu1 %v3939_v24 }
  0x48   : > { %3223 = vmatprep.subr.mxu0 %v4071_v30  ;;  %3253 = vmatprep.subr.mxu1 %v3950_v27 }
  0x49   : > { %3224 = vmatpush3.msra.mxu0 %v4071_v30  ;;  %3254 = vmatpush3.msra.mxu1 %v3950_v27 }
  0x4a   : > { %3225 = vmatprep.subr.mxu0 %v4089_v40  ;;  %3255 = vmatprep.subr.mxu1 %v3970_v34 }
  0x4b   : > { %3158 = vmatprep.mubr.f32.mxu0 %v414_v46  ;;  %3226 = vmatpush3.msra.mxu0 %v4089_v40 }
  0x4c   : > { %3256 = vmatpush3.msra.mxu1 %v3970_v34  ;;  %3159 = vmatmul.mubr.f32.gmra.mxu0 %v424_v53 }
  0x4d   : > { %3227 = vmatprep.subr.mxu0 %v4101_v51  ;;  %3257 = vmatprep.subr.mxu1 %v4001_v45 }
  0x4e   : > { %3228 = vmatpush3.msra.mxu0 %v4101_v51  ;;  %3258 = vmatpush3.msra.mxu1 %v4001_v45 }
  0x4f   : > { %3229 = vmatprep.subr.mxu0 %v4111_v59  ;;  %3259 = vmatprep.subr.mxu1 %v4007_v47 }
  0x50   : > { %3230 = vmatpush3.msra.mxu0 %v4111_v59  ;;  %3231 = vmatprep.mubr.f32.mxu0 %v4068_v25 }
  0x51   : > { %3260 = vmatpush3.msra.mxu1 %v4007_v47  ;;  %3232 = vmatmul.mubr.f32.vlgmr.msra.gmra.mxu0 %v4077_v32 }
  0x52   : > { %3261 = vmatprep.subr.mxu1 %v4027_v57  ;;  %3275 = vmatprep.subr.mxu0 %v3931_v21 }
  0x53   : > { %3262 = vmatpush3.msra.mxu1 %v4027_v57  ;;  %3276 = vmatpush3.msra.mxu0 %v3931_v21  ;;  %v5256_v21 = vand.u32 4294901760, %v4068_v25 }
  0x54   : > { %3196 = vmatprep.mubr.f32.mxu1 %v4153_v14  ;;  %3263 = vmatprep.subr.mxu1 %v4056_v8 }
  0x55   : > { %3277 = vmatprep.subr.mxu0 %v3934_v22  ;;  %3197 = vmatmul.mubr.f32.gmra.mxu1 %v4157_v15 }
  0x56   : > { %3264 = vmatpush3.msra.mxu1 %v4056_v8  ;;  %3278 = vmatpush3.msra.mxu0 %v3934_v22  ;;  %v5257_v22 = vand.u32 4294901760, %v4077_v32 }
  0x57   : > { %3234 = vmatprep.mubr.f32.mxu0 %v4166_v17  ;;  %3265 = vmatprep.subr.mxu1 %v4074_v31  ;;  %v4455_v17 = vsub.f32 %v1097_v55, %v4442_v2 }
  0x58   : > { %3279 = vmatprep.subr.mxu0 %v3937_v23  ;;  %3235 = vmatmul.mubr.f32.gmra.mxu0 %v4171_v19  ;;  %v4457_v19 = vand.u32 4294901760, %v1096_v50 }
  0x59   : > { %3266 = vmatpush3.msra.mxu1 %v4074_v31  ;;  %3280 = vmatpush3.msra.mxu0 %v3937_v23  ;;  %v4467_v43 = vand.u32 4294901760, %v4455_v17 }
  0x5a   : > { %3267 = vmatprep.subr.mxu1 %v4086_v38  ;;  %3281 = vmatprep.subr.mxu0 %v3948_v26  ;;  %v4470_v46 = vsub.f32 %v1096_v50, %v4457_v19 }
  0x5b   : > { %3268 = vmatpush3.msra.mxu1 %v4086_v38  ;;  %3269 = vmatprep.mubr.f32.mxu1 %v5256_v21  ;;  %5267 = vst [vmem:[#allocation11_spill] sm:$0xff] %v4467_v43  ;;  %v1094_v21 = vld [vmem:[%s5171_s3 + $0x18] sm:$0xff] }
  0x5c   : > { %3282 = vmatpush3.msra.mxu0 %v3948_v26  ;;  %3270 = vmatmul.mubr.f32.vlgmr.msra.gmra.mxu1 %v5257_v22  ;;  %v1103_v26 = vld [vmem:[%s5171_s3 + $0x60] sm:$0xff] }
  0x5d   : > { %3283 = vmatprep.subr.mxu0 %v3953_v28  ;;  %3313 = vmatprep.subr.mxu1 %v3880_v3 }
  0x5e   : > { %3284 = vmatpush3.msra.mxu0 %v3953_v28  ;;  %3314 = vmatpush3.msra.mxu1 %v3880_v3  ;;  %v1106_v3 = vld [vmem:[%s5171_s3 + $0x78] sm:$0xff] }
  0x5f   : > { %3285 = vmatprep.subr.mxu0 %v3979_v39  ;;  %3315 = vmatprep.subr.mxu1 %v3882_v4 }
  0x60   : > { %3272 = vmatprep.mubr.f32.mxu1 %v412_v20  ;;  %3286 = vmatpush3.msra.mxu0 %v3979_v39  ;;  %v4352_v39 = vand.u32 4294901760, %v1103_v26  ;;  %v1095_v20 = vld [vmem:[%s5171_s3 + $0x20] sm:$0xff] }
  0x61   : > { %3316 = vmatpush3.msra.mxu1 %v3882_v4  ;;  %3287 = vmatprep.subr.mxu0 %v3995_v42  ;;  %v4316_v4 = vand.u32 4294901760, %v1106_v3  ;;  %v4473_v53 = vand.u32 4294901760, %v1095_v20 }
  0x62   : > { %3273 = vmatmul.mubr.f32.gmra.mxu1 %v422_v29  ;;  %3317 = vmatprep.subr.mxu1 %v3884_v5 }
  0x63   : > { %3288 = vmatpush3.msra.mxu0 %v3995_v42  ;;  %3318 = vmatpush3.msra.mxu1 %v3884_v5  ;;  %v1105_v5 = vld [vmem:[%s5171_s3 + $0x70] sm:$0xff]  ;;  %v1102_v42 = vld [vmem:[%s5171_s3 + $0x58] sm:$0xff] }
  0x64   : > { %3289 = vmatprep.subr.mxu0 %v4017_v52  ;;  %3319 = vmatprep.subr.mxu1 %v3895_v9 }
  0x65   : > { %3290 = vmatpush3.msra.mxu0 %v4017_v52  ;;  %3320 = vmatpush3.msra.mxu1 %v3895_v9  ;;  %v4322_v9 = vsub.f32 %v1106_v3, %v4316_v4  ;;  %v4364_v52 = vand.u32 4294901760, %v1102_v42  ;;  %v1302_v3 = vsub.f32 %v4455_v17, %v4467_v43 }
  0x66   : > { %3291 = vmatprep.subr.mxu0 %v4030_v58  ;;  %3321 = vmatprep.subr.mxu1 %v3897_v10 }
  0x67   : > { %3292 = vmatpush3.msra.mxu0 %v4030_v58  ;;  %3322 = vmatpush3.msra.mxu1 %v3897_v10  ;;  %v4324_v10 = vand.u32 4294901760, %v1105_v5  ;;  %v4381_v6 = vsub.f32 %v1102_v42, %v4364_v52  ;;  %v1303_v42 = vand.u32 4294901760, %v1302_v3 }
  0x68   : > { %3293 = vmatprep.subr.mxu0 %v4047_v1  ;;  %3323 = vmatprep.subr.mxu1 %v3899_v11 }
  0x69   : > { %3294 = vmatpush3.msra.mxu0 %v4047_v1  ;;  %3324 = vmatpush3.msra.mxu1 %v3899_v11  ;;  %v1104_v11 = vld [vmem:[%s5171_s3 + $0x68] sm:$0xff]  ;;  %v4335_v23 = vsub.f32 %v1105_v5, %v4324_v10  ;;  %v4377_v1 = vsub.f32 %v1103_v26, %v4352_v39  ;;  %v4397_v32 = vand.u32 4294901760, %v4381_v6  ;;  %v4482_v5 = vand.u32 4294901760, %v4470_v46 }
  0x6a   : > { %3295 = vmatprep.subr.mxu0 %v4062_v13  ;;  %3325 = vmatprep.subr.mxu1 %v3914_v16  ;;  %v4487_v26 = vsub.f32 %v1095_v20, %v4473_v53 }
  0x6b   : > { %3296 = vmatpush3.msra.mxu0 %v4062_v13  ;;  %3326 = vmatpush3.msra.mxu1 %v3914_v16  ;;  %v4332_v16 = vand.u32 4294901760, %v4322_v9  ;;  %v4347_v28 = vand.u32 4294901760, %v4335_v23  ;;  %5262 = vst [vmem:[#allocation6_spill] sm:$0xff] %v4397_v32  ;;  %5268 = vst [vmem:[#allocation12_spill] sm:$0xff] %v4482_v5 }
  0x6c   : > { %3297 = vmatprep.subr.mxu0 %v4083_v37  ;;  %3327 = vmatprep.subr.mxu1 %v3939_v24 }
  0x6d   : > { %3298 = vmatpush3.msra.mxu0 %v4083_v37  ;;  %3328 = vmatpush3.msra.mxu1 %v3939_v24  ;;  %5258 = vst [vmem:[#allocation2_spill] sm:$0xff] %v4332_v16  ;;  %v4337_v24 = vand.u32 4294901760, %v1104_v11  ;;  %5259 = vst [vmem:[#allocation3_spill] sm:$0xff] %v4347_v28 }
  0x6e   : > { %3299 = vmatprep.subr.mxu0 %v4096_v49  ;;  %3329 = vmatprep.subr.mxu1 %v3950_v27 }
  0x6f   : > { %3300 = vmatpush3.msra.mxu0 %v4096_v49  ;;  %3330 = vmatpush3.msra.mxu1 %v3950_v27  ;;  %v1239_v27 = vsub.f32 %v4322_v9, %v4332_v16  ;;  %v1267_v49 = vsub.f32 %v4381_v6, %v4397_v32 }
  0x70   : > { %3301 = vmatprep.subr.mxu0 %v4108_v56  ;;  %3331 = vmatprep.subr.mxu1 %v3970_v34 }
  0x71   : > { %3302 = vmatpush3.msra.mxu0 %v4108_v56  ;;  %3332 = vmatpush3.msra.mxu1 %v3970_v34  ;;  %v4350_v34 = vsub.f32 %v1104_v11, %v4337_v24  ;;  %v1240_v60 = vand.u32 4294901760, %v1239_v27  ;;  %v1099_v56 = vld [vmem:[%s5171_s3 + $0x40] sm:$0xff]  ;;  %v1268_v18 = vand.u32 4294901760, %v1267_v49  ;;  %v4484_v11 = vand.u32 4294901760, %v1094_v21  ;;  %v1093_v27 = vld [vmem:[%s5171_s3 + $0x10] sm:$0xff] }
  0x72   : > { %3303 = vmatprep.subr.mxu0 %v4124_v12  ;;  %3333 = vmatprep.subr.mxu1 %v4001_v45 }
  0x73   : > { %3304 = vmatpush3.msra.mxu0 %v4124_v12  ;;  %3334 = vmatpush3.msra.mxu1 %v4001_v45  ;;  %v1101_v45 = vld [vmem:[%s5171_s3 + $0x50] sm:$0xff]  ;;  %v4419_v12 = vand.u32 4294901760, %v1099_v56 }
  0x74   : > { %3305 = vmatprep.subr.mxu0 %v4131_v36  ;;  %3335 = vmatprep.subr.mxu1 %v4007_v47 }
  0x75   : > { %3306 = vmatpush3.msra.mxu0 %v4131_v36  ;;  %3307 = vmatprep.mubr.f32.mxu0 %v4038_v61  ;;  %v4427_v41 = vsub.f32 %v1099_v56, %v4419_v12  ;;  %v1091_v56 = vld [vmem:[%s5171_s3] sm:$0xff] }
  0x76   : > { %3336 = vmatpush3.msra.mxu1 %v4007_v47  ;;  %3308 = vmatmul.mubr.f32.vlgmr.msra.gmra.mxu0 %v4041_v62  ;;  %v1100_v47 = vld [vmem:[%s5171_s3 + $0x48] sm:$0xff]  ;;  %v4531_v35 = vand.u32 4294901760, %v1091_v56 }
  0x77   : > { %3337 = vmatprep.subr.mxu1 %v4027_v57  ;;  %3310 = vmatprep.mubr.f32.mxu0 %v4153_v14  ;;  %v4368_v58 = vand.u32 4294901760, %v1100_v47  ;;  %v4437_v63 = vand.u32 4294901760, %v4427_v41 }
  0x78   : > { %3338 = vmatpush3.msra.mxu1 %v4027_v57  ;;  %3345 = vmatprep.mubr.f32.mxu1 %v4038_v61  ;;  %v4366_v57 = vand.u32 4294901760, %v1101_v45  ;;  %v1246_v61 = vsub.f32 %v4335_v23, %v4347_v28 }
  0x79   : > { %3339 = vmatprep.subr.mxu1 %v4056_v8  ;;  %3351 = vmatprep.subr.mxu0 %v4316_v4  ;;  %v4387_v13 = vsub.f32 %v1100_v47, %v4368_v58  ;;  %5265 = vst [vmem:[#allocation9_spill] sm:$0xff] %v4437_v63  ;;  %v4496_v47 = vsub.f32 %v1094_v21, %v4484_v11 }
  0x7a   : > { %3340 = vmatpush3.msra.mxu1 %v4056_v8  ;;  %3311 = vmatmul.mubr.f32.gmra.mxu0 %v4157_v15  ;;  %v4384_v8 = vsub.f32 %v1101_v45, %v4366_v57  ;;  %v1247_v25 = vand.u32 4294901760, %v1246_v61  ;;  %v1309_v45 = vsub.f32 %v4470_v46, %v4482_v5  ;;  %v4502_v61 = vand.u32 4294901760, %v4487_v26 }
  0x7b   : > { %3341 = vmatprep.subr.mxu1 %v4074_v31  ;;  %3352 = vmatpush3.msra.mxu0 %v4316_v4  ;;  %5269 = vst [vmem:[#allocation13_spill] sm:$0xff] %v4496_v47 }
  0x7c   : > { %3342 = vmatpush3.msra.mxu1 %v4074_v31  ;;  %3353 = vmatprep.subr.mxu0 %v4324_v10  ;;  %v4393_v31 = vand.u32 4294901760, %v4377_v1  ;;  %v4400_v37 = vand.u32 4294901760, %v4384_v8  ;;  %5270 = vst [vmem:[#allocation14_spill] sm:$0xff] %v4502_v61 }
  0x7d   : > { %3343 = vmatprep.subr.mxu1 %v4086_v38  ;;  %3354 = vmatpush3.msra.mxu0 %v4324_v10 }
  0x7e   : > { %3344 = vmatpush3.msra.mxu1 %v4086_v38  ;;  %3355 = vmatprep.subr.mxu0 %v4337_v24  ;;  %5261 = vst [vmem:[#allocation5_spill] sm:$0xff] %v4393_v31  ;;  %5263 = vst [vmem:[#allocation7_spill] sm:$0xff] %v4400_v37  ;;  %v4403_v38 = vand.u32 4294901760, %v4387_v13  ;;  %v1260_v48 = vsub.f32 %v4377_v1, %v4393_v31  ;;  %v1274_v51 = vsub.f32 %v4384_v8, %v4400_v37 }
  0x7f   : > { %3346 = vmatmul.mubr.f32.vlgmr.msra.gmra.mxu1 %v4041_v62  ;;  %3356 = vmatpush3.msra.mxu0 %v4337_v24  ;;  %v4374_v62 = vand.u32 4294901760, %v4350_v34 }
  0x80   : > { %3348 = vmatprep.mubr.f32.mxu1 %v4153_v14  ;;  %3357 = vmatprep.subr.mxu0 %v4352_v39  ;;  %5264 = vst [vmem:[#allocation8_spill] sm:$0xff] %v4403_v38  ;;  %v1261_v59 = vand.u32 4294901760, %v1260_v48  ;;  %v1281_v7 = vsub.f32 %v4387_v13, %v4403_v38  ;;  %v1275_v36 = vand.u32 4294901760, %v1274_v51  ;;  %v1288_v14 = vsub.f32 %v4427_v41, %v4437_v63 }
  0x81   : > { %5260 = vst [vmem:[#allocation4_spill] sm:$0xff] %v4374_v62  ;;  %3358 = vmatpush3.msra.mxu0 %v4352_v39  ;;  %3389 = vmatprep.subr.mxu1 %v1240_v60  ;;  %v1253_v30 = vsub.f32 %v4350_v34, %v4374_v62  ;;  %v1316_v51 = vsub.f32 %v4487_v26, %v4502_v61 }
  0x82   : > { %3359 = vmatprep.subr.mxu0 %v4364_v52  ;;  %3390 = vmatpush3.msra.mxu1 %v1240_v60  ;;  %v1282_v54 = vand.u32 4294901760, %v1281_v7  ;;  %v1289_v29 = vand.u32 4294901760, %v1288_v14  ;;  %v4498_v60 = vand.u32 4294901760, %v1093_v27  ;;  %v4541_v14 = vsub.f32 %v1091_v56, %v4531_v35 }
  0x83   : > { %3349 = vmatmul.mubr.f32.gmra.mxu1 %v4157_v15  ;;  %3360 = vmatpush3.msra.mxu0 %v4364_v52  ;;  %v1254_v40 = vand.u32 4294901760, %v1253_v30  ;;  %v4452_v15 = vand.u32 4294901760, %v4440_v0  ;;  %v1310_v30 = vand.u32 4294901760, %v1309_v45 }
  0x84   : > { %3391 = vmatprep.subr.mxu1 %v1247_v25  ;;  %3361 = vmatprep.subr.mxu0 %v4366_v57  ;;  %v4512_v48 = vsub.f32 %v1093_v27, %v4498_v60  ;;  %5276 = vst [vmem:[#allocation20_spill] sm:$0xff] %v4541_v14 }
  0x85   : > { %3392 = vmatpush3.msra.mxu1 %v1247_v25  ;;  %3362 = vmatpush3.msra.mxu0 %v4366_v57  ;;  %5266 = vst [vmem:[#allocation10_spill] sm:$0xff] %v4452_v15  ;;  %v1295_v33 = vsub.f32 %v4440_v0, %v4452_v15  ;;  %v1092_v25 = vld [vmem:[%s5171_s3 + $0x8] sm:$0xff] }
  0x86   : > { %3393 = vmatprep.subr.mxu1 %v1254_v40  ;;  %3363 = vmatprep.subr.mxu0 %v4368_v58  ;;  %5272 = vst [vmem:[#allocation16_spill] sm:$0xff] %v4512_v48  ;;  %v4514_v49 = vand.u32 4294901760, %v1092_v25  ;;  %v4526_v7 = vand.u32 4294901760, %v4512_v48 }
  0x87   : > { %3394 = vmatpush3.msra.mxu1 %v1254_v40  ;;  %3364 = vmatpush3.msra.mxu0 %v4368_v58  ;;  %v1296_v22 = vand.u32 4294901760, %v1295_v33  ;;  %v4509_v40 = vand.u32 4294901760, %v4496_v47  ;;  %v4548_v33 = vand.u32 4294901760, %v4541_v14 }
  0x88   : > { %3395 = vmatprep.subr.mxu1 %v1261_v59  ;;  %3365 = vmatprep.subr.mxu0 %v4419_v12  ;;  %5273 = vst [vmem:[#allocation17_spill] sm:$0xff] %v4526_v7 }
  0x89   : > { %3396 = vmatpush3.msra.mxu1 %v1261_v59  ;;  %3366 = vmatpush3.msra.mxu0 %v4419_v12  ;;  %5271 = vst [vmem:[#allocation15_spill] sm:$0xff] %v4509_v40  ;;  %v1323_v59 = vsub.f32 %v4496_v47, %v4509_v40  ;;  %5277 = vst [vmem:[#allocation21_spill] sm:$0xff] %v4548_v33 }
  0x8a   : > { %3397 = vmatprep.subr.mxu1 %v1268_v18  ;;  %3367 = vmatprep.subr.mxu0 %v4429_v44 }
  0x8b   : > { %3398 = vmatpush3.msra.mxu1 %v1268_v18  ;;  %3368 = vmatpush3.msra.mxu0 %v4429_v44  ;;  %v4529_v18 = vsub.f32 %v1092_v25, %v4514_v49  ;;  %v1324_v55 = vand.u32 4294901760, %v1323_v59 }
  0x8c   : > { %3399 = vmatprep.subr.mxu1 %v1275_v36  ;;  %3369 = vmatprep.subr.mxu0 %v4442_v2 }
  0x8d   : > { %3400 = vmatpush3.msra.mxu1 %v1275_v36  ;;  %3370 = vmatpush3.msra.mxu0 %v4442_v2  ;;  %5274 = vst [vmem:[#allocation18_spill] sm:$0xff] %v4529_v18  ;;  %v1317_v36 = vand.u32 4294901760, %v1316_v51  ;;  %v4538_v50 = vand.u32 4294901760, %v4529_v18 }
  0x8e   : > { %3401 = vmatprep.subr.mxu1 %v1282_v54  ;;  %3371 = vmatprep.subr.mxu0 %v4457_v19 }
  0x8f   : > { %3402 = vmatpush3.msra.mxu1 %v1282_v54  ;;  %3372 = vmatpush3.msra.mxu0 %v4457_v19  ;;  %v1330_v54 = vsub.f32 %v4512_v48, %v4526_v7  ;;  %5275 = vst [vmem:[#allocation19_spill] sm:$0xff] %v4538_v50 }
  0x90   : > { %3403 = vmatprep.subr.mxu1 %v1289_v29  ;;  %3373 = vmatprep.subr.mxu0 %v4473_v53 }
  0x91   : > { %3404 = vmatpush3.msra.mxu1 %v1289_v29  ;;  %3374 = vmatpush3.msra.mxu0 %v4473_v53  ;;  %v1331_v20 = vand.u32 4294901760, %v1330_v54  ;;  %v1337_v29 = vsub.f32 %v4529_v18, %v4538_v50 }
  0x92   : > { %3405 = vmatprep.subr.mxu1 %v1296_v22  ;;  %3375 = vmatprep.subr.mxu0 %v4484_v11 }
  0x93   : > { %3406 = vmatpush3.msra.mxu1 %v1296_v22  ;;  %3376 = vmatpush3.msra.mxu0 %v4484_v11  ;;  %v1338_v21 = vand.u32 4294901760, %v1337_v29  ;;  %v1344_v22 = vsub.f32 %v4541_v14, %v4548_v33 }
  0x94   : > { %3407 = vmatprep.subr.mxu1 %v1303_v42  ;;  %3377 = vmatprep.subr.mxu0 %v4498_v60 }
  0x95   : > { %3408 = vmatpush3.msra.mxu1 %v1303_v42  ;;  %3378 = vmatpush3.msra.mxu0 %v4498_v60  ;;  %v1345_v3 = vand.u32 4294901760, %v1344_v22 }
  0x96   : > { %3409 = vmatprep.subr.mxu1 %v1310_v30  ;;  %3379 = vmatprep.subr.mxu0 %v4514_v49 }
  0x97   : > { %3410 = vmatpush3.msra.mxu1 %v1310_v30  ;;  %3380 = vmatpush3.msra.mxu0 %v4514_v49 }
  0x98   : > { %3411 = vmatprep.subr.mxu1 %v1317_v36  ;;  %3381 = vmatprep.subr.mxu0 %v4531_v35 }
  0x99   : > { %3412 = vmatpush3.msra.mxu1 %v1317_v36  ;;  %3382 = vmatpush3.msra.mxu0 %v4531_v35 }
  0x9a   : > { %3413 = vmatprep.subr.mxu1 %v1324_v55  ;;  %3427 = vmatprep.subr.mxu0 %v4322_v9 }
  0x9b   : > { %3414 = vmatpush3.msra.mxu1 %v1324_v55 }
  0x9c   : > { %3415 = vmatprep.subr.mxu1 %v1331_v20 }
  0x9d   : > { %3416 = vmatpush3.msra.mxu1 %v1331_v20  ;;  %v2758_v20 = vld [vmem:[%s5170_s2] ss:$0 sm:$0xff] }
  0x9e   : > { %3417 = vmatprep.subr.mxu1 %v1338_v21 }
  0x9f   : > { %3418 = vmatpush3.msra.mxu1 %v1338_v21 }
  0xa0   : > { %3419 = vmatprep.subr.mxu1 %v1345_v3 }
  0xa1   : > { %3420 = vmatpush3.msra.mxu1 %v1345_v3 }
  0xa2   : > { %3465 = vmatprep.subr.mxu1 %v4316_v4 }
  0xef   : > { %v3157_v27 = vpop.f32.mrf.mxu0 }
  0xf0   : > { %v407_v21 = vadd.f32 %v3157_v27, %v2758_v20 }
  0xf1   : > { %v396_v42 = vpop.f32.mrf.mxu0 }
  0xf2   : > { %v397_v33 = vadd.f32 %v2758_v20, %v396_v42 }
  0xf7   : > { %v3195_v25 = vpop.f32.mrf.mxu1 }
  0xf8   : > { %v584_v61 = vadd.f32 %v3195_v25, %v407_v21 }
  0xf9   : > { %v577_v51 = vpop.f32.mrf.mxu1 }
  0xfa   : > { %v578_v15 = vadd.f32 %v577_v51, %v397_v33 }
 0x10c   : > { %v3160_v45 = vpop.f32.mrf.mxu0 }
 0x10d   : > { %v427_v50 = vadd.f32 %v3160_v45, %v2758_v20 }
 0x10e   : > { %v416_v30 = vpop.f32.mrf.mxu0 }
 0x10f   : > { %v417_v40 = vadd.f32 %v2758_v20, %v416_v30 }
 0x111   : > { %v3233_v56 = vpop.f32.mrf.mxu0 }
 0x112   : > { %v707_v63 = vadd.f32 %v3233_v56, %v584_v61 }
 0x113   : > { %v699_v36 = vpop.f32.mrf.mxu0 }
 0x114   : > { %v700_v32 = vadd.f32 %v699_v36, %v578_v15 }
 0x115   : > { %v3198_v59 = vpop.f32.mrf.mxu1 }
 0x116   : > { %v596_v38 = vadd.f32 %v3198_v59, %v427_v50 }
 0x117   : > { %v589_v55 = vpop.f32.mrf.mxu1 }
 0x118   : > { %v3236_v54 = vpop.f32.mrf.mxu0  ;;  %v590_v37 = vadd.f32 %v589_v55, %v417_v40 }
 0x119   : > { %v721_v16 = vadd.f32 %v3236_v54, %v596_v38 }
 0x11a   : > { %v713_v22 = vpop.f32.mrf.mxu0 }
 0x11b   : > { %v714_v18 = vadd.f32 %v713_v22, %v590_v37 }
 0x11c   : > { %v3271_v29 = vpop.f32.mrf.mxu1 }
 0x11d   : > { %v818_v31 = vadd.f32 %v3271_v29, %v707_v63 }
 0x11e   : > { %v809_v3 = vpop.f32.mrf.mxu1 }
 0x11f   : > { %v810_v14 = vadd.f32 %v809_v3, %v700_v32 }
 0x122   : > { %v3274_v43 = vpop.f32.mrf.mxu1 }
 0x123   : > { %v834_v42 = vadd.f32 %v3274_v43, %v721_v16 }
 0x124   : > { %v825_v28 = vpop.f32.mrf.mxu1 }
 0x125   : > { %v826_v25 = vadd.f32 %v825_v28, %v714_v18 }
 0x136   : > { %v3309_v7 = vpop.f32.mrf.mxu0 }
 0x137   : > { %v959_v27 = vadd.f32 %v3309_v7, %v818_v31 }
 0x138   : > { %v952_v5 = vpop.f32.mrf.mxu0 }
 0x139   : > { %v953_v45 = vadd.f32 %v952_v5, %v810_v14 }
 0x13a   : > { %v3312_v62 = vpop.f32.mrf.mxu0 }
 0x13b   : > { %v971_v21 = vadd.f32 %v3312_v62, %v834_v42 }
 0x13c   : > { %v964_v47 = vpop.f32.mrf.mxu0 }
 0x13d   : > { %v965_v40 = vadd.f32 %v964_v47, %v826_v25 }
 0x13f   : > { %v3347_v48 = vpop.f32.mrf.mxu1 }
 0x140   : > { %v1064_v30 = vadd.f32 %v3347_v48, %v959_v27 }
 0x141   : > { %v1057_v20 = vpop.f32.mrf.mxu1 }
 0x142   : > { %vm1080_vm0 = vcmp.gt.f32.partialorder %v1064_v30, 0.0  ;;  %v1084_v61 = vmul.f32 0.01, %v1064_v30  ;;  %v1058_v50 = vadd.f32 %v1057_v20, %v953_v45 }
 0x143   : > { %v3350_v15 = vpop.f32.mrf.mxu1 }
 0x144   : > { %v1088_v63 = vsel %vm1080_vm0, %v1064_v30, %v1084_v61  ;;  %vm1079_vm1 = vcmp.gt.f32.partialorder %v1058_v50, 0.0  ;;  %v1083_v33 = vmul.f32 0.01, %v1058_v50  ;;  %v1076_v38 = vadd.f32 %v3350_v15, %v971_v21 }
 0x145   : > { %v4558_v32 = vand.u32 4294901760, %v1088_v63  ;;  %v1069_v31 = vpop.f32.mrf.mxu1 }
 0x146   : > { %v1087_v37 = vsel %vm1079_vm1, %v1058_v50, %v1083_v33  ;;  %vm1082_vm2 = vcmp.gt.f32.partialorder %v1076_v38, 0.0  ;;  %v1086_v16 = vmul.f32 0.01, %v1076_v38  ;;  %v1070_v43 = vadd.f32 %v1069_v31, %v965_v40  ;;  %v1906_v40 = vld [vmem:[%s5173_s5 + $0x50] sm:$0xff] }
 0x147   : > { %v4561_v28 = vsub.f32 %v1088_v63, %v4558_v32  ;;  %v4563_v62 = vand.u32 4294901760, %v1087_v37  ;;  %v4775_v63 = vand.u32 4294901760, %v1906_v40 }
 0x148   : > { %v1090_v5 = vsel %vm1082_vm2, %v1076_v38, %v1086_v16  ;;  %vm1081_vm3 = vcmp.gt.f32.partialorder %v1070_v43, 0.0  ;;  %v1085_v47 = vmul.f32 0.01, %v1070_v43 }
 0x149   : > { %v1207_v48 = vand.u32 4294901760, %v4561_v28  ;;  %v1196_v7 = vsub.f32 %v1087_v37, %v4563_v62  ;;  %v4567_v18 = vand.u32 4294901760, %v1090_v5  ;;  %3421 = vmatprep.mubr.f32.mxu1 %v4563_v62  ;;  %v4794_v16 = vsub.f32 %v1906_v40, %v4775_v63 }
 0x14a   : > { %v1089_v14 = vsel %vm1081_vm3, %v1070_v43, %v1085_v47  ;;  %3422 = vmatmul.mubr.f32.vlgmr.msra.gmra.mxu1 %v4558_v32 }
 0x14b   : > { %v4572_v51 = vsub.f32 %v1090_v5, %v4567_v18  ;;  %v4574_v56 = vand.u32 4294901760, %v1089_v14  ;;  %3466 = vmatpush3.msra.mxu1 %v4316_v4  ;;  %v1197_v59 = vand.u32 4294901760, %v1196_v7  ;;  %v1208_v36 = vsub.f32 %v4561_v28, %v1207_v48 }
 0x14c   : > { %3467 = vmatprep.subr.mxu1 %v4324_v10 }
 0x14d   : > { %v4582_v55 = vsub.f32 %v1089_v14, %v4574_v56  ;;  %3468 = vmatpush3.msra.mxu1 %v4324_v10  ;;  %3424 = vmatprep.mubr.f32.mxu1 %v4574_v56  ;;  %v1198_v54 = vsub.f32 %v1196_v7, %v1197_v59  ;;  %v1227_v29 = vand.u32 4294901760, %v4572_v51  ;;  %v1209_v27 = vand.u32 4294901760, %v1208_v36 }
 0x14e   : > { %3469 = vmatprep.subr.mxu1 %v4337_v24  ;;  %3425 = vmatmul.mubr.f32.gmra.mxu1 %v4567_v18 }
 0x14f   : > { %3470 = vmatpush3.msra.mxu1 %v4337_v24  ;;  %3497 = vmatprep.mubr.f32.mxu1 %v1197_v59  ;;  %v1199_v22 = vand.u32 4294901760, %v1198_v54  ;;  %v1217_v3 = vand.u32 4294901760, %v4582_v55  ;;  %v1228_v45 = vsub.f32 %v4572_v51, %v1227_v29 }
 0x150   : > { %3471 = vmatprep.subr.mxu1 %v4352_v39 }
 0x151   : > { %3472 = vmatpush3.msra.mxu1 %v4352_v39  ;;  %3383 = vmatprep.mubr.f32.mxu0 %v1199_v22  ;;  %v1218_v42 = vsub.f32 %v4582_v55, %v1217_v3  ;;  %v1229_v25 = vand.u32 4294901760, %v1228_v45 }
 0x152   : > { %3473 = vmatprep.subr.mxu1 %v4364_v52  ;;  %3384 = vmatmul.mubr.f32.vlgmr.msra.gmra.mxu0 %v1209_v27 }
 0x153   : > { %3428 = vmatpush3.msra.mxu0 %v4322_v9  ;;  %3474 = vmatpush3.msra.mxu1 %v4364_v52  ;;  %v1219_v30 = vand.u32 4294901760, %v1218_v42  ;;  %v5278_v9 = vld [vmem:[#allocation13_spill] sm:$0xff] }
 0x154   : > { %3429 = vmatprep.subr.mxu0 %v4335_v23  ;;  %3475 = vmatprep.subr.mxu1 %v4366_v57  ;;  %v1903_v42 = vld [vmem:[%s5173_s5 + $0x38] sm:$0xff] }
 0x155   : > { %3430 = vmatpush3.msra.mxu0 %v4335_v23  ;;  %3476 = vmatpush3.msra.mxu1 %v4366_v57  ;;  %v5279_v23 = vld [vmem:[#allocation16_spill] sm:$0xff] }
 0x156   : > { %3386 = vmatprep.mubr.f32.mxu0 %v1219_v30  ;;  %3431 = vmatprep.subr.mxu0 %v4350_v34 }
 0x157   : > { %3477 = vmatprep.subr.mxu1 %v4368_v58  ;;  %3387 = vmatmul.mubr.f32.gmra.mxu0 %v1229_v25 }
 0x158   : > { %3432 = vmatpush3.msra.mxu0 %v4350_v34  ;;  %3478 = vmatpush3.msra.mxu1 %v4368_v58  ;;  %v5280_v34 = vld [vmem:[#allocation18_spill] sm:$0xff] }
 0x159   : > { %3433 = vmatprep.subr.mxu0 %v4377_v1  ;;  %3459 = vmatprep.mubr.f32.mxu0 %v1196_v7 }
 0x15a   : > { %3479 = vmatprep.subr.mxu1 %v4419_v12  ;;  %3434 = vmatpush3.msra.mxu0 %v4377_v1  ;;  %v5287_v1 = vld [vmem:[#allocation7_spill] sm:$0xff] }
 0x15b   : > { %3480 = vmatpush3.msra.mxu1 %v4419_v12  ;;  %3435 = vmatprep.subr.mxu0 %v4381_v6 }
 0x15c   : > { %3481 = vmatprep.subr.mxu1 %v4429_v44  ;;  %3436 = vmatpush3.msra.mxu0 %v4381_v6  ;;  %v5289_v6 = vld [vmem:[#allocation9_spill] sm:$0xff] }
 0x15d   : > { %3482 = vmatpush3.msra.mxu1 %v4429_v44  ;;  %3437 = vmatprep.subr.mxu0 %v4384_v8 }
 0x15e   : > { %3483 = vmatprep.subr.mxu1 %v4442_v2  ;;  %3438 = vmatpush3.msra.mxu0 %v4384_v8  ;;  %v5290_v8 = vld [vmem:[#allocation10_spill] sm:$0xff] }
 0x15f   : > { %3484 = vmatpush3.msra.mxu1 %v4442_v2  ;;  %3439 = vmatprep.subr.mxu0 %v4387_v13 }
 0x160   : > { %3485 = vmatprep.subr.mxu1 %v4457_v19  ;;  %3440 = vmatpush3.msra.mxu0 %v4387_v13  ;;  %v5291_v13 = vld [vmem:[#allocation11_spill] sm:$0xff] }
 0x161   : > { %3486 = vmatpush3.msra.mxu1 %v4457_v19  ;;  %3441 = vmatprep.subr.mxu0 %v4427_v41 }
 0x162   : > { %3487 = vmatprep.subr.mxu1 %v4473_v53  ;;  %3442 = vmatpush3.msra.mxu0 %v4427_v41  ;;  %v5293_v41 = vld [vmem:[#allocation14_spill] sm:$0xff] }
 0x163   : > { %3488 = vmatpush3.msra.mxu1 %v4473_v53  ;;  %3443 = vmatprep.subr.mxu0 %v4440_v0 }
 0x164   : > { %3489 = vmatprep.subr.mxu1 %v4484_v11  ;;  %3444 = vmatpush3.msra.mxu0 %v4440_v0  ;;  %v5295_v0 = vld [vmem:[#allocation17_spill] sm:$0xff] }
 0x165   : > { %3490 = vmatpush3.msra.mxu1 %v4484_v11  ;;  %3445 = vmatprep.subr.mxu0 %v4455_v17 }
 0x166   : > { %3491 = vmatprep.subr.mxu1 %v4498_v60  ;;  %3446 = vmatpush3.msra.mxu0 %v4455_v17  ;;  %v5297_v17 = vld [vmem:[#allocation21_spill] sm:$0xff] }
 0x167   : > { %3492 = vmatpush3.msra.mxu1 %v4498_v60  ;;  %3447 = vmatprep.subr.mxu0 %v4470_v46 }
 0x168   : > { %3493 = vmatprep.subr.mxu1 %v4514_v49  ;;  %3448 = vmatpush3.msra.mxu0 %v4470_v46 }
 0x169   : > { %3494 = vmatpush3.msra.mxu1 %v4514_v49  ;;  %3449 = vmatprep.subr.mxu0 %v4487_v26 }
 0x16a   : > { %3495 = vmatprep.subr.mxu1 %v4531_v35  ;;  %3450 = vmatpush3.msra.mxu0 %v4487_v26 }
 0x16b   : > { %3496 = vmatpush3.msra.mxu1 %v4531_v35  ;;  %3451 = vmatprep.subr.mxu0 %v5278_v9 }
 0x16c   : > { %3498 = vmatmul.mubr.f32.vlgmr.msra.gmra.mxu1 %v1207_v48  ;;  %3541 = vmatprep.subr.mxu1 %v4316_v4  ;;  %v4810_v48 = vand.u32 4294901760, %v4794_v16 }
 0x16d   : > { %3452 = vmatpush3.msra.mxu0 %v5278_v9  ;;  %3500 = vmatprep.mubr.f32.mxu1 %v1217_v3  ;;  %v4849_v9 = vand.u32 4294901760, %v1903_v42 }
 0x16e   : > { %3542 = vmatpush3.msra.mxu1 %v4316_v4  ;;  %3453 = vmatprep.subr.mxu0 %v5279_v23  ;;  %v5281_v4 = vld [vmem:[#allocation20_spill] sm:$0xff] }
 0x16f   : > { %3543 = vmatprep.subr.mxu1 %v4324_v10  ;;  %3454 = vmatpush3.msra.mxu0 %v5279_v23  ;;  %v1902_v23 = vld [vmem:[%s5173_s5 + $0x30] sm:$0xff] }
 0x170   : > { %3544 = vmatpush3.msra.mxu1 %v4324_v10  ;;  %3455 = vmatprep.subr.mxu0 %v5280_v34  ;;  %v5282_v10 = vld [vmem:[#allocation2_spill] sm:$0xff] }
 0x171   : > { %3501 = vmatmul.mubr.f32.gmra.mxu1 %v1227_v29  ;;  %3545 = vmatprep.subr.mxu1 %v4337_v24  ;;  %v1904_v29 = vld [vmem:[%s5173_s5 + $0x40] sm:$0xff] }
 0x172   : > { %3456 = vmatpush3.msra.mxu0 %v5280_v34  ;;  %3546 = vmatpush3.msra.mxu1 %v4337_v24  ;;  %v5283_v24 = vld [vmem:[#allocation3_spill] sm:$0xff]  ;;  %v4836_v27 = vand.u32 4294901760, %v1904_v29 }
 0x173   : > { %3573 = vmatprep.mubr.f32.mxu1 %v4563_v62  ;;  %3457 = vmatprep.subr.mxu0 %v5281_v4  ;;  %5303 = vst [vmem:[#allocation3_spill] sm:$0xff] %v4810_v48 }
 0x174   : > { %3547 = vmatprep.subr.mxu1 %v4352_v39  ;;  %3458 = vmatpush3.msra.mxu0 %v5281_v4  ;;  %v4847_v25 = vsub.f32 %v1904_v29, %v4836_v27 }
 0x175   : > { %3548 = vmatpush3.msra.mxu1 %v4352_v39  ;;  %3460 = vmatmul.mubr.f32.vlgmr.msra.gmra.mxu0 %v4561_v28  ;;  %v5284_v39 = vld [vmem:[#allocation4_spill] sm:$0xff] }
 0x176   : > { %3503 = vmatprep.subr.mxu0 %v5282_v10  ;;  %3549 = vmatprep.subr.mxu1 %v4364_v52  ;;  %v4859_v4 = vand.u32 4294901760, %v4847_v25 }
 0x177   : > { %3462 = vmatprep.mubr.f32.mxu0 %v4582_v55  ;;  %3504 = vmatpush3.msra.mxu0 %v5282_v10  ;;  %v2079_v55 = vsub.f32 %v4794_v16, %v4810_v48  ;;  %v4862_v10 = vsub.f32 %v1903_v42, %v4849_v9 }
 0x178   : > { %3550 = vmatpush3.msra.mxu1 %v4364_v52  ;;  %3505 = vmatprep.subr.mxu0 %v5283_v24  ;;  %v5285_v52 = vld [vmem:[#allocation5_spill] sm:$0xff] }
 0x179   : > { %3551 = vmatprep.subr.mxu1 %v4366_v57  ;;  %3506 = vmatpush3.msra.mxu0 %v5283_v24  ;;  %v2080_v45 = vand.u32 4294901760, %v2079_v55  ;;  %5305 = vst [vmem:[#allocation5_spill] sm:$0xff] %v4859_v4  ;;  %v4864_v24 = vand.u32 4294901760, %v1902_v23  ;;  %v1896_v55 = vld [vmem:[%s5173_s5] sm:$0xff] }
 0x17a   : > { %3552 = vmatpush3.msra.mxu1 %v4366_v57  ;;  %3463 = vmatmul.mubr.f32.gmra.mxu0 %v4572_v51  ;;  %v5286_v57 = vld [vmem:[#allocation6_spill] sm:$0xff] }
 0x17b   : > { %3507 = vmatprep.subr.mxu0 %v5284_v39  ;;  %3553 = vmatprep.subr.mxu1 %v4368_v58 }
 0x17c   : > { %3508 = vmatpush3.msra.mxu0 %v5284_v39  ;;  %3535 = vmatprep.mubr.f32.mxu0 %v4563_v62  ;;  %v1901_v39 = vld [vmem:[%s5173_s5 + $0x28] sm:$0xff] }
 0x17d   : > { %3554 = vmatpush3.msra.mxu1 %v4368_v58  ;;  %3509 = vmatprep.subr.mxu0 %v5285_v52  ;;  %v5288_v58 = vld [vmem:[#allocation8_spill] sm:$0xff] }
 0x17e   : > { %3555 = vmatprep.subr.mxu1 %v4419_v12  ;;  %3510 = vmatpush3.msra.mxu0 %v5285_v52 }
 0x17f   : > { %3556 = vmatpush3.msra.mxu1 %v4419_v12  ;;  %3511 = vmatprep.subr.mxu0 %v5286_v57  ;;  %v5292_v12 = vld [vmem:[#allocation12_spill] sm:$0xff] }
 0x180   : > { %3557 = vmatprep.subr.mxu1 %v4429_v44  ;;  %3512 = vmatpush3.msra.mxu0 %v5286_v57  ;;  %v2093_v57 = vsub.f32 %v4847_v25, %v4859_v4 }
 0x181   : > { %3558 = vmatpush3.msra.mxu1 %v4429_v44  ;;  %3513 = vmatprep.subr.mxu0 %v5287_v1  ;;  %v5294_v44 = vld [vmem:[#allocation15_spill] sm:$0xff] }
 0x182   : > { %3559 = vmatprep.subr.mxu1 %v4442_v2  ;;  %3514 = vmatpush3.msra.mxu0 %v5287_v1  ;;  %v4874_v1 = vand.u32 4294901760, %v4862_v10 }
 0x183   : > { %3560 = vmatpush3.msra.mxu1 %v4442_v2  ;;  %3515 = vmatprep.subr.mxu0 %v5288_v58  ;;  %v5296_v2 = vld [vmem:[#allocation19_spill] sm:$0xff] }
 0x184   : > { %3561 = vmatprep.subr.mxu1 %v4457_v19  ;;  %3516 = vmatpush3.msra.mxu0 %v5288_v58  ;;  %5306 = vst [vmem:[#allocation6_spill] sm:$0xff] %v4874_v1  ;;  %v4877_v58 = vsub.f32 %v1902_v23, %v4864_v24  ;;  %v4954_v23 = vand.u32 4294901760, %v1896_v55 }
 0x185   : > { %3562 = vmatpush3.msra.mxu1 %v4457_v19  ;;  %3517 = vmatprep.subr.mxu0 %v5289_v6  ;;  %v1911_v19 = vld [vmem:[%s5173_s5 + $0x78] sm:$0xff] }
 0x186   : > { %3563 = vmatprep.subr.mxu1 %v4473_v53  ;;  %3518 = vmatpush3.msra.mxu0 %v5289_v6  ;;  %v4738_v46 = vand.u32 4294901760, %v1911_v19  ;;  %v4880_v6 = vand.u32 4294901760, %v1901_v39 }
 0x187   : > { %3564 = vmatpush3.msra.mxu1 %v4473_v53  ;;  %3519 = vmatprep.subr.mxu0 %v5290_v8  ;;  %v1910_v53 = vld [vmem:[%s5173_s5 + $0x70] sm:$0xff] }
 0x188   : > { %3565 = vmatprep.subr.mxu1 %v4484_v11  ;;  %3520 = vmatpush3.msra.mxu0 %v5290_v8  ;;  %v4746_v26 = vand.u32 4294901760, %v1910_v53  ;;  %v1900_v8 = vld [vmem:[%s5173_s5 + $0x20] sm:$0xff] }
 0x189   : > { %3566 = vmatpush3.msra.mxu1 %v4484_v11  ;;  %3521 = vmatprep.subr.mxu0 %v5291_v13  ;;  %v4744_v11 = vsub.f32 %v1911_v19, %v4738_v46 }
 0x18a   : > { %3567 = vmatprep.subr.mxu1 %v4498_v60  ;;  %3522 = vmatpush3.msra.mxu0 %v5291_v13  ;;  %v4763_v21 = vsub.f32 %v1910_v53, %v4746_v26  ;;  %v2094_v13 = vand.u32 4294901760, %v2093_v57  ;;  %v4964_v57 = vsub.f32 %v1896_v55, %v4954_v23 }
 0x18b   : > { %3568 = vmatpush3.msra.mxu1 %v4498_v60  ;;  %3523 = vmatprep.subr.mxu0 %v5292_v12  ;;  %v1909_v60 = vld [vmem:[%s5173_s5 + $0x68] sm:$0xff]  ;;  %v4760_v20 = vand.u32 4294901760, %v4744_v11 }
 0x18c   : > { %3569 = vmatprep.subr.mxu1 %v4514_v49  ;;  %3524 = vmatpush3.msra.mxu0 %v5292_v12  ;;  %v4765_v61 = vand.u32 4294901760, %v1909_v60  ;;  %v4781_v38 = vand.u32 4294901760, %v4763_v21  ;;  %v2100_v12 = vsub.f32 %v4862_v10, %v4874_v1  ;;  %5315 = vst [vmem:[#allocation17_spill] sm:$0xff] %v4964_v57 }
 0x18d   : > { %3570 = vmatpush3.msra.mxu1 %v4514_v49  ;;  %3525 = vmatprep.subr.mxu0 %v5293_v41  ;;  %v1908_v49 = vld [vmem:[%s5173_s5 + $0x60] sm:$0xff]  ;;  %5298 = vst [vmem:[#allocation13_spill] sm:$0xff] %v4760_v20  ;;  %v2044_v33 = vsub.f32 %v4744_v11, %v4760_v20 }
 0x18e   : > { %3571 = vmatprep.subr.mxu1 %v4531_v35  ;;  %3526 = vmatpush3.msra.mxu0 %v5293_v41  ;;  %v4767_v50 = vand.u32 4294901760, %v1908_v49  ;;  %5299 = vst [vmem:[#allocation16_spill] sm:$0xff] %v4781_v38  ;;  %v2051_v28 = vsub.f32 %v4763_v21, %v4781_v38  ;;  %v4889_v41 = vand.u32 4294901760, %v4877_v58 }
 0x18f   : > { %3572 = vmatpush3.msra.mxu1 %v4531_v35  ;;  %3527 = vmatprep.subr.mxu0 %v5294_v44  ;;  %v1907_v35 = vld [vmem:[%s5173_s5 + $0x58] sm:$0xff]  ;;  %v2045_v43 = vand.u32 4294901760, %v2044_v33 }
 0x190   : > { %3574 = vmatmul.mubr.f32.vlgmr.msra.gmra.mxu1 %v4558_v32  ;;  %3528 = vmatpush3.msra.mxu0 %v5294_v44  ;;  %v4773_v15 = vand.u32 4294901760, %v1907_v35  ;;  %v4787_v31 = vsub.f32 %v1908_v49, %v4767_v50  ;;  %v2052_v7 = vand.u32 4294901760, %v2051_v28  ;;  %5307 = vst [vmem:[#allocation7_spill] sm:$0xff] %v4889_v41  ;;  %v4891_v44 = vand.u32 4294901760, %v1900_v8 }
 0x191   : > { %3576 = vmatprep.mubr.f32.mxu1 %v4574_v56  ;;  %3529 = vmatprep.subr.mxu0 %v5295_v0  ;;  %v2107_v19 = vsub.f32 %v4877_v58, %v4889_v41 }
 0x192   : > { %3530 = vmatpush3.msra.mxu0 %v5295_v0  ;;  %v4791_v37 = vsub.f32 %v1907_v35, %v4773_v15  ;;  %v4803_v5 = vand.u32 4294901760, %v4787_v31  ;;  %3617 = vmatprep.subr.mxu1 %v2045_v43  ;;  %v4894_v0 = vsub.f32 %v1901_v39, %v4880_v6  ;;  %v4903_v53 = vsub.f32 %v1900_v8, %v4891_v44  ;;  %v1898_v35 = vld [vmem:[%s5173_s5 + $0x10] sm:$0xff] }
 0x193   : > { %3531 = vmatprep.subr.mxu0 %v5296_v2  ;;  %3618 = vmatpush3.msra.mxu1 %v2045_v43  ;;  %v2108_v40 = vand.u32 4294901760, %v2107_v19  ;;  %v4921_v28 = vand.u32 4294901760, %v1898_v35 }
 0x194   : > { %3577 = vmatmul.mubr.f32.gmra.mxu1 %v4567_v18  ;;  %3532 = vmatpush3.msra.mxu0 %v5296_v2  ;;  %5301 = vst [vmem:[#allocation20_spill] sm:$0xff] %v4803_v5  ;;  %v4807_v47 = vand.u32 4294901760, %v4791_v37  ;;  %v2065_v14 = vsub.f32 %v4787_v31, %v4803_v5  ;;  %v1899_v2 = vld [vmem:[%s5173_s5 + $0x18] sm:$0xff]  ;;  %v4909_v49 = vand.u32 4294901760, %v4894_v0  ;;  %v4916_v33 = vand.u32 4294901760, %v4903_v53 }
 0x195   : > { %3533 = vmatprep.subr.mxu0 %v5297_v17  ;;  %3619 = vmatprep.subr.mxu1 %v2052_v7 }
 0x196   : > { %3534 = vmatpush3.msra.mxu0 %v5297_v17  ;;  %5302 = vst [vmem:[#allocation2_spill] sm:$0xff] %v4807_v47  ;;  %v2072_v51 = vsub.f32 %v4791_v37, %v4807_v47  ;;  %v2066_v36 = vand.u32 4294901760, %v2065_v14  ;;  %3620 = vmatpush3.msra.mxu1 %v2052_v7  ;;  %v2101_v17 = vand.u32 4294901760, %v2100_v12  ;;  %5308 = vst [vmem:[#allocation8_spill] sm:$0xff] %v4909_v49  ;;  %v4971_v12 = vand.u32 4294901760, %v4964_v57 }
 0x197   : > { %3536 = vmatmul.mubr.f32.vlgmr.msra.gmra.mxu0 %v4558_v32  ;;  %3579 = vmatprep.subr.mxu0 %v4738_v46  ;;  %v4784_v32 = vsub.f32 %v1909_v60, %v4765_v61  ;;  %v4905_v60 = vand.u32 4294901760, %v1899_v2  ;;  %5309 = vst [vmem:[#allocation9_spill] sm:$0xff] %v4916_v33  ;;  %v2114_v7 = vsub.f32 %v4894_v0, %v4909_v49 }
 0x198   : > { %3538 = vmatprep.mubr.f32.mxu0 %v4574_v56  ;;  %3580 = vmatpush3.msra.mxu0 %v4738_v46  ;;  %v1905_v56 = vld [vmem:[%s5173_s5 + $0x48] sm:$0xff]  ;;  %v2073_v22 = vand.u32 4294901760, %v2072_v51  ;;  %v2121_v14 = vsub.f32 %v4903_v53, %v4916_v33  ;;  %5316 = vst [vmem:[#allocation19_spill] sm:$0xff] %v4971_v12 }
 0x199   : > { %3581 = vmatprep.subr.mxu0 %v4746_v26  ;;  %v4800_v62 = vand.u32 4294901760, %v4784_v32  ;;  %v4826_v54 = vand.u32 4294901760, %v1905_v56  ;;  %v4919_v43 = vsub.f32 %v1899_v2, %v4905_v60 }
 0x19a   : > { %3582 = vmatpush3.msra.mxu0 %v4746_v26  ;;  %v2122_v29 = vand.u32 4294901760, %v2121_v14 }
 0x19b   : > { %3539 = vmatmul.mubr.f32.gmra.mxu0 %v4567_v18  ;;  %3583 = vmatprep.subr.mxu0 %v4765_v61  ;;  %5300 = vst [vmem:[#allocation18_spill] sm:$0xff] %v4800_v62  ;;  %v2058_v18 = vsub.f32 %v4784_v32, %v4800_v62  ;;  %v4834_v3 = vsub.f32 %v1905_v56, %v4826_v54  ;;  %v4933_v51 = vand.u32 4294901760, %v4919_v43 }
 0x19c   : > { %3584 = vmatpush3.msra.mxu0 %v4765_v61  ;;  %v4936_v56 = vsub.f32 %v1898_v35, %v4921_v28 }
 0x19d   : > { %3585 = vmatprep.subr.mxu0 %v4767_v50  ;;  %v2059_v59 = vand.u32 4294901760, %v2058_v18  ;;  %v4844_v30 = vand.u32 4294901760, %v4834_v3  ;;  %v1897_v18 = vld [vmem:[%s5173_s5 + $0x8] sm:$0xff]  ;;  %5310 = vst [vmem:[#allocation10_spill] sm:$0xff] %v4933_v51 }
 0x19e   : > { %3586 = vmatpush3.msra.mxu0 %v4767_v50  ;;  %5311 = vst [vmem:[#allocation11_spill] sm:$0xff] %v4936_v56  ;;  %v4948_v42 = vand.u32 4294901760, %v4936_v56 }
 0x19f   : > { %3587 = vmatprep.subr.mxu0 %v4773_v15  ;;  %3621 = vmatprep.subr.mxu1 %v2059_v59  ;;  %5304 = vst [vmem:[#allocation4_spill] sm:$0xff] %v4844_v30  ;;  %v2086_v34 = vsub.f32 %v4834_v3, %v4844_v30 }
 0x1a0   : > { %3588 = vmatpush3.msra.mxu0 %v4773_v15  ;;  %3622 = vmatpush3.msra.mxu1 %v2059_v59  ;;  %v4938_v59 = vand.u32 4294901760, %v1897_v18  ;;  %5312 = vst [vmem:[#allocation12_spill] sm:$0xff] %v4948_v42  ;;  %v2135_v39 = vsub.f32 %v4936_v56, %v4948_v42 }
 0x1a1   : > { %3589 = vmatprep.subr.mxu0 %v4775_v63  ;;  %3623 = vmatprep.subr.mxu1 %v2066_v36  ;;  %v2087_v52 = vand.u32 4294901760, %v2086_v34 }
 0x1a2   : > { %3590 = vmatpush3.msra.mxu0 %v4775_v63  ;;  %3624 = vmatpush3.msra.mxu1 %v2066_v36  ;;  %v2115_v36 = vand.u32 4294901760, %v2114_v7  ;;  %v2136_v8 = vand.u32 4294901760, %v2135_v39 }
 0x1a3   : > { %3591 = vmatprep.subr.mxu0 %v4826_v54  ;;  %3625 = vmatprep.subr.mxu1 %v2073_v22 }
 0x1a4   : > { %3592 = vmatpush3.msra.mxu0 %v4826_v54  ;;  %3626 = vmatpush3.msra.mxu1 %v2073_v22  ;;  %v2128_v22 = vsub.f32 %v4919_v43, %v4933_v51 }
 0x1a5   : > { %3593 = vmatprep.subr.mxu0 %v4836_v27  ;;  %3627 = vmatprep.subr.mxu1 %v2080_v45 }
 0x1a6   : > { %3594 = vmatpush3.msra.mxu0 %v4836_v27  ;;  %3628 = vmatpush3.msra.mxu1 %v2080_v45  ;;  %v4951_v45 = vsub.f32 %v1897_v18, %v4938_v59  ;;  %v2129_v34 = vand.u32 4294901760, %v2128_v22 }
 0x1a7   : > { %3595 = vmatprep.subr.mxu0 %v4849_v9  ;;  %3629 = vmatprep.subr.mxu1 %v2087_v52 }
 0x1a8   : > { %3596 = vmatpush3.msra.mxu0 %v4849_v9  ;;  %3630 = vmatpush3.msra.mxu1 %v2087_v52  ;;  %5313 = vst [vmem:[#allocation14_spill] sm:$0xff] %v4951_v45  ;;  %v4960_v52 = vand.u32 4294901760, %v4951_v45 }
 0x1a9   : > { %3597 = vmatprep.subr.mxu0 %v4864_v24  ;;  %3631 = vmatprep.subr.mxu1 %v2094_v13 }
 0x1aa   : > { %3598 = vmatpush3.msra.mxu0 %v4864_v24  ;;  %3632 = vmatpush3.msra.mxu1 %v2094_v13  ;;  %5314 = vst [vmem:[#allocation15_spill] sm:$0xff] %v4960_v52  ;;  %v2142_v13 = vsub.f32 %v4951_v45, %v4960_v52 }
 0x1ab   : > { %3599 = vmatprep.subr.mxu0 %v4880_v6  ;;  %3633 = vmatprep.subr.mxu1 %v2101_v17 }
 0x1ac   : > { %3600 = vmatpush3.msra.mxu0 %v4880_v6  ;;  %3634 = vmatpush3.msra.mxu1 %v2101_v17  ;;  %v2143_v2 = vand.u32 4294901760, %v2142_v13  ;;  %v2149_v17 = vsub.f32 %v4964_v57, %v4971_v12 }
 0x1ad   : > { %3601 = vmatprep.subr.mxu0 %v4891_v44  ;;  %3635 = vmatprep.subr.mxu1 %v2108_v40 }
 0x1ae   : > { %3602 = vmatpush3.msra.mxu0 %v4891_v44  ;;  %3636 = vmatpush3.msra.mxu1 %v2108_v40  ;;  %v2150_v19 = vand.u32 4294901760, %v2149_v17 }
 0x1af   : > { %3603 = vmatprep.subr.mxu0 %v4905_v60  ;;  %3637 = vmatprep.subr.mxu1 %v2115_v36 }
 0x1b0   : > { %3604 = vmatpush3.msra.mxu0 %v4905_v60  ;;  %3638 = vmatpush3.msra.mxu1 %v2115_v36 }
 0x1b1   : > { %3605 = vmatprep.subr.mxu0 %v4921_v28  ;;  %3639 = vmatprep.subr.mxu1 %v2122_v29 }
 0x1b2   : > { %3606 = vmatpush3.msra.mxu0 %v4921_v28  ;;  %3640 = vmatpush3.msra.mxu1 %v2122_v29 }
 0x1b3   : > { %3607 = vmatprep.subr.mxu0 %v4938_v59  ;;  %3641 = vmatprep.subr.mxu1 %v2129_v34 }
 0x1b4   : > { %3608 = vmatpush3.msra.mxu0 %v4938_v59  ;;  %3642 = vmatpush3.msra.mxu1 %v2129_v34  ;;  %v2759_v34 = vld [vmem:[%s5172_s4] ss:$0 sm:$0xff] }
 0x1b5   : > { %3609 = vmatprep.subr.mxu0 %v4954_v23  ;;  %3643 = vmatprep.subr.mxu1 %v2136_v8 }
 0x1b6   : > { %3610 = vmatpush3.msra.mxu0 %v4954_v23  ;;  %3644 = vmatpush3.msra.mxu1 %v2136_v8 }
 0x1b7   : > { %3655 = vmatprep.subr.mxu0 %v4744_v11  ;;  %3645 = vmatprep.subr.mxu1 %v2143_v2 }
 0x1b8   : > { %3646 = vmatpush3.msra.mxu1 %v2143_v2 }
 0x1b9   : > { %3647 = vmatprep.subr.mxu1 %v2150_v19 }
 0x1ba   : > { %3648 = vmatpush3.msra.mxu1 %v2150_v19 }
 0x1bb   : > { %3693 = vmatprep.subr.mxu1 %v4738_v46 }
 0x20a   : > { %v3423_v35 = vpop.f32.mrf.mxu1 }
 0x20c   : > { %v1382_v7 = vpop.f32.mrf.mxu1 }
 0x20e   : > { %v3426_v14 = vpop.f32.mrf.mxu1 }
 0x210   : > { %v1394_v55 = vpop.f32.mrf.mxu1 }
 0x212   : > { %v3385_v40 = vpop.f32.mrf.mxu0 }
 0x213   : > { %v1212_v13 = vadd.f32 %v3385_v40, %v2759_v34 }
 0x214   : > { %v1201_v18 = vpop.f32.mrf.mxu0 }
 0x215   : > { %v1202_v17 = vadd.f32 %v2759_v34, %v1201_v18  ;;  %v1389_v52 = vadd.f32 %v3423_v35, %v1212_v13 }
 0x217   : > { %v3388_v36 = vpop.f32.mrf.mxu0  ;;  %v1383_v49 = vadd.f32 %v1382_v7, %v1202_v17 }
 0x218   : > { %v1232_v12 = vadd.f32 %v3388_v36, %v2759_v34 }
 0x219   : > { %v1221_v22 = vpop.f32.mrf.mxu0 }
 0x21a   : > { %v1222_v41 = vadd.f32 %v2759_v34, %v1221_v22  ;;  %v1401_v4 = vadd.f32 %v3426_v14, %v1232_v12 }
 0x21c   : > { %v1395_v62 = vadd.f32 %v1394_v55, %v1222_v41 }
 0x22c   : > { %v3499_v29 = vpop.f32.mrf.mxu1 }
 0x22e   : > { %v1614_v8 = vpop.f32.mrf.mxu1 }
 0x231   : > { %v3502_v19 = vpop.f32.mrf.mxu1 }
 0x233   : > { %v1630_v51 = vpop.f32.mrf.mxu1 }
 0x235   : > { %v3461_v39 = vpop.f32.mrf.mxu0 }
 0x236   : > { %v1512_v33 = vadd.f32 %v3461_v39, %v1389_v52 }
 0x237   : > { %v1504_v2 = vpop.f32.mrf.mxu0 }
 0x238   : > { %v1505_v1 = vadd.f32 %v1504_v2, %v1383_v49  ;;  %v1623_v5 = vadd.f32 %v3499_v29, %v1512_v33 }
 0x23a   : > { %v3464_v42 = vpop.f32.mrf.mxu0  ;;  %v1615_v57 = vadd.f32 %v1614_v8, %v1505_v1 }
 0x23b   : > { %v1526_v47 = vadd.f32 %v3464_v42, %v1401_v4 }
 0x23c   : > { %v1518_v48 = vpop.f32.mrf.mxu0 }
 0x23d   : > { %v1519_v18 = vadd.f32 %v1518_v48, %v1395_v62  ;;  %v1639_v13 = vadd.f32 %v3502_v19, %v1526_v47 }
 0x23f   : > { %v1631_v14 = vadd.f32 %v1630_v51, %v1519_v18 }
 0x250   : > { %v3575_v30 = vpop.f32.mrf.mxu1 }
 0x252   : > { %v1862_v20 = vpop.f32.mrf.mxu1 }
 0x254   : > { %v3578_v52 = vpop.f32.mrf.mxu1 }
 0x256   : > { %v1874_v62 = vpop.f32.mrf.mxu1 }
 0x257   : > { %v3537_v38 = vpop.f32.mrf.mxu0 }
 0x258   : > { %v1764_v40 = vadd.f32 %v3537_v38, %v1623_v5 }
 0x259   : > { %v1757_v45 = vpop.f32.mrf.mxu0 }
 0x25a   : > { %v1869_v36 = vadd.f32 %v3575_v30, %v1764_v40  ;;  %v1758_v35 = vadd.f32 %v1757_v45, %v1615_v57 }
 0x25b   : > { %v3540_v56 = vpop.f32.mrf.mxu0 }
 0x25c   : > { %vm1885_vm4 = vcmp.gt.f32.partialorder %v1869_v36, 0.0  ;;  %v1889_v7 = vmul.f32 0.01, %v1869_v36  ;;  %v1863_v49 = vadd.f32 %v1862_v20, %v1758_v35  ;;  %v1776_v12 = vadd.f32 %v3540_v56, %v1639_v13 }
 0x25d   : > { %v1769_v22 = vpop.f32.mrf.mxu0 }
 0x25e   : > { %v1893_v4 = vsel %vm1885_vm4, %v1869_v36, %v1889_v7  ;;  %vm1884_vm5 = vcmp.gt.f32.partialorder %v1863_v49, 0.0  ;;  %v1888_v41 = vmul.f32 0.01, %v1863_v49  ;;  %v1881_v33 = vadd.f32 %v3578_v52, %v1776_v12  ;;  %v2760_v12 = vld [vmem:[%s5174_s6] ss:$0 sm:$0xff] }
 0x25f   : > { %v4980_v42 = vand.u32 4294901760, %v1893_v4  ;;  %v1770_v38 = vadd.f32 %v1769_v22, %v1631_v14 }
 0x260   : > { %v1892_v5 = vsel %vm1884_vm5, %v1863_v49, %v1888_v41  ;;  %vm1887_vm6 = vcmp.gt.f32.partialorder %v1881_v33, 0.0  ;;  %v1891_v48 = vmul.f32 0.01, %v1881_v33 }
 0x261   : > { %v4983_v47 = vsub.f32 %v1893_v4, %v4980_v42  ;;  %v1875_v30 = vadd.f32 %v1874_v62, %v1770_v38  ;;  %v4985_v1 = vand.u32 4294901760, %v1892_v5 }
 0x262   : > { %v1895_v20 = vsel %vm1887_vm6, %v1881_v33, %v1891_v48 }
 0x263   : > { %v2012_v51 = vand.u32 4294901760, %v4983_v47  ;;  %vm1886_vm7 = vcmp.gt.f32.partialorder %v1875_v30, 0.0  ;;  %v1890_v56 = vmul.f32 0.01, %v1875_v30  ;;  %3649 = vmatprep.mubr.f32.mxu1 %v4985_v1  ;;  %v4989_v45 = vand.u32 4294901760, %v1895_v20 }
 0x264   : > { %3650 = vmatmul.mubr.f32.vlgmr.msra.gmra.mxu1 %v4980_v42  ;;  %v2001_v57 = vsub.f32 %v1892_v5, %v4985_v1 }
 0x265   : > { %v1894_v55 = vsel %vm1886_vm7, %v1875_v30, %v1890_v56  ;;  %3694 = vmatpush3.msra.mxu1 %v4738_v46  ;;  %v4995_v29 = vsub.f32 %v1895_v20, %v4989_v45  ;;  %v2013_v8 = vsub.f32 %v4983_v47, %v2012_v51 }
 0x266   : > { %3695 = vmatprep.subr.mxu1 %v4746_v26  ;;  %v4998_v34 = vand.u32 4294901760, %v1894_v55  ;;  %v2002_v39 = vand.u32 4294901760, %v2001_v57 }
 0x267   : > { %3696 = vmatpush3.msra.mxu1 %v4746_v26  ;;  %v2032_v19 = vand.u32 4294901760, %v4995_v29  ;;  %v2014_v36 = vand.u32 4294901760, %v2013_v8 }
 0x268   : > { %3652 = vmatprep.mubr.f32.mxu1 %v4998_v34  ;;  %3697 = vmatprep.subr.mxu1 %v4765_v61  ;;  %v2003_v2 = vsub.f32 %v2001_v57, %v2002_v39  ;;  %v5007_v17 = vsub.f32 %v1894_v55, %v4998_v34 }
 0x269   : > { %3653 = vmatmul.mubr.f32.gmra.mxu1 %v4989_v45  ;;  %v2033_v13 = vsub.f32 %v4995_v29, %v2032_v19 }
 0x26a   : > { %3698 = vmatpush3.msra.mxu1 %v4765_v61  ;;  %3725 = vmatprep.mubr.f32.mxu1 %v2002_v39  ;;  %v2004_v40 = vand.u32 4294901760, %v2003_v2  ;;  %v2022_v18 = vand.u32 4294901760, %v5007_v17 }
 0x26b   : > { %3699 = vmatprep.subr.mxu1 %v4767_v50  ;;  %v2034_v7 = vand.u32 4294901760, %v2033_v13 }
 0x26c   : > { %3700 = vmatpush3.msra.mxu1 %v4767_v50  ;;  %3611 = vmatprep.mubr.f32.mxu0 %v2004_v40  ;;  %v2023_v35 = vsub.f32 %v5007_v17, %v2022_v18 }
 0x26d   : > { %3701 = vmatprep.subr.mxu1 %v4773_v15  ;;  %3612 = vmatmul.mubr.f32.vlgmr.msra.gmra.mxu0 %v2014_v36 }
 0x26e   : > { %3656 = vmatpush3.msra.mxu0 %v4744_v11  ;;  %3702 = vmatpush3.msra.mxu1 %v4773_v15  ;;  %v2024_v52 = vand.u32 4294901760, %v2023_v35  ;;  %v5317_v11 = vld [vmem:[#allocation11_spill] sm:$0xff] }
 0x26f   : > { %3657 = vmatprep.subr.mxu0 %v4763_v21  ;;  %3703 = vmatprep.subr.mxu1 %v4775_v63 }
 0x270   : > { %3658 = vmatpush3.msra.mxu0 %v4763_v21  ;;  %3704 = vmatpush3.msra.mxu1 %v4775_v63  ;;  %v5318_v21 = vld [vmem:[#allocation14_spill] sm:$0xff] }
 0x271   : > { %3614 = vmatprep.mubr.f32.mxu0 %v2024_v52  ;;  %3659 = vmatprep.subr.mxu0 %v4784_v32 }
 0x272   : > { %3705 = vmatprep.subr.mxu1 %v4826_v54  ;;  %3615 = vmatmul.mubr.f32.gmra.mxu0 %v2034_v7 }
 0x273   : > { %3660 = vmatpush3.msra.mxu0 %v4784_v32  ;;  %3706 = vmatpush3.msra.mxu1 %v4826_v54  ;;  %v5325_v32 = vld [vmem:[#allocation3_spill] sm:$0xff] }
 0x274   : > { %3661 = vmatprep.subr.mxu0 %v4787_v31  ;;  %3687 = vmatprep.mubr.f32.mxu0 %v2001_v57 }
 0x275   : > { %3707 = vmatprep.subr.mxu1 %v4836_v27  ;;  %3662 = vmatpush3.msra.mxu0 %v4787_v31  ;;  %v5326_v31 = vld [vmem:[#allocation4_spill] sm:$0xff] }
 0x276   : > { %3708 = vmatpush3.msra.mxu1 %v4836_v27  ;;  %3663 = vmatprep.subr.mxu0 %v4791_v37 }
 0x277   : > { %3709 = vmatprep.subr.mxu1 %v4849_v9  ;;  %3664 = vmatpush3.msra.mxu0 %v4791_v37  ;;  %v5327_v37 = vld [vmem:[#allocation5_spill] sm:$0xff] }
 0x278   : > { %3710 = vmatpush3.msra.mxu1 %v4849_v9  ;;  %3665 = vmatprep.subr.mxu0 %v4794_v16 }
 0x279   : > { %3711 = vmatprep.subr.mxu1 %v4864_v24  ;;  %3666 = vmatpush3.msra.mxu0 %v4794_v16  ;;  %v5328_v16 = vld [vmem:[#allocation6_spill] sm:$0xff] }
 0x27a   : > { %3712 = vmatpush3.msra.mxu1 %v4864_v24  ;;  %3667 = vmatprep.subr.mxu0 %v4834_v3 }
 0x27b   : > { %3713 = vmatprep.subr.mxu1 %v4880_v6  ;;  %3668 = vmatpush3.msra.mxu0 %v4834_v3  ;;  %v5330_v3 = vld [vmem:[#allocation8_spill] sm:$0xff] }
 0x27c   : > { %3714 = vmatpush3.msra.mxu1 %v4880_v6  ;;  %3669 = vmatprep.subr.mxu0 %v4847_v25 }
 0x27d   : > { %3715 = vmatprep.subr.mxu1 %v4891_v44  ;;  %3670 = vmatpush3.msra.mxu0 %v4847_v25  ;;  %v5332_v25 = vld [vmem:[#allocation10_spill] sm:$0xff] }
 0x27e   : > { %3716 = vmatpush3.msra.mxu1 %v4891_v44  ;;  %3671 = vmatprep.subr.mxu0 %v4862_v10 }
 0x27f   : > { %3717 = vmatprep.subr.mxu1 %v4905_v60  ;;  %3672 = vmatpush3.msra.mxu0 %v4862_v10  ;;  %v5334_v10 = vld [vmem:[#allocation15_spill] sm:$0xff] }
 0x280   : > { %3718 = vmatpush3.msra.mxu1 %v4905_v60  ;;  %3673 = vmatprep.subr.mxu0 %v4877_v58 }
 0x281   : > { %3719 = vmatprep.subr.mxu1 %v4921_v28  ;;  %3674 = vmatpush3.msra.mxu0 %v4877_v58 }
 0x282   : > { %3720 = vmatpush3.msra.mxu1 %v4921_v28  ;;  %3675 = vmatprep.subr.mxu0 %v4894_v0 }
 0x283   : > { %3721 = vmatprep.subr.mxu1 %v4938_v59  ;;  %3676 = vmatpush3.msra.mxu0 %v4894_v0 }
 0x284   : > { %3722 = vmatpush3.msra.mxu1 %v4938_v59  ;;  %3677 = vmatprep.subr.mxu0 %v4903_v53 }
 0x285   : > { %3723 = vmatprep.subr.mxu1 %v4954_v23  ;;  %3678 = vmatpush3.msra.mxu0 %v4903_v53 }
 0x286   : > { %3724 = vmatpush3.msra.mxu1 %v4954_v23  ;;  %3679 = vmatprep.subr.mxu0 %v4919_v43 }
 0x287   : > { %3726 = vmatmul.mubr.f32.vlgmr.msra.gmra.mxu1 %v2012_v51  ;;  %3769 = vmatprep.subr.mxu1 %v4738_v46 }
 0x288   : > { %3680 = vmatpush3.msra.mxu0 %v4919_v43  ;;  %3728 = vmatprep.mubr.f32.mxu1 %v2022_v18 }
 0x289   : > { %3770 = vmatpush3.msra.mxu1 %v4738_v46  ;;  %3681 = vmatprep.subr.mxu0 %v5317_v11  ;;  %v5319_v46 = vld [vmem:[#allocation17_spill] sm:$0xff] }
 0x28a   : > { %3771 = vmatprep.subr.mxu1 %v4746_v26  ;;  %3682 = vmatpush3.msra.mxu0 %v5317_v11 }
 0x28b   : > { %3772 = vmatpush3.msra.mxu1 %v4746_v26  ;;  %3683 = vmatprep.subr.mxu0 %v5318_v21  ;;  %v5320_v26 = vld [vmem:[#allocation13_spill] sm:$0xff] }
 0x28c   : > { %3729 = vmatmul.mubr.f32.gmra.mxu1 %v2032_v19  ;;  %3773 = vmatprep.subr.mxu1 %v4765_v61 }
 0x28d   : > { %3684 = vmatpush3.msra.mxu0 %v5318_v21  ;;  %3774 = vmatpush3.msra.mxu1 %v4765_v61  ;;  %v5321_v61 = vld [vmem:[#allocation16_spill] sm:$0xff] }
 0x28e   : > { %3801 = vmatprep.mubr.f32.mxu1 %v4985_v1  ;;  %3685 = vmatprep.subr.mxu0 %v5319_v46 }
 0x28f   : > { %3775 = vmatprep.subr.mxu1 %v4767_v50  ;;  %3686 = vmatpush3.msra.mxu0 %v5319_v46 }
 0x290   : > { %3776 = vmatpush3.msra.mxu1 %v4767_v50  ;;  %3688 = vmatmul.mubr.f32.vlgmr.msra.gmra.mxu0 %v4983_v47  ;;  %v5322_v50 = vld [vmem:[#allocation18_spill] sm:$0xff] }
 0x291   : > { %3731 = vmatprep.subr.mxu0 %v5320_v26  ;;  %3777 = vmatprep.subr.mxu1 %v4773_v15 }
 0x292   : > { %3690 = vmatprep.mubr.f32.mxu0 %v5007_v17  ;;  %3732 = vmatpush3.msra.mxu0 %v5320_v26 }
 0x293   : > { %3778 = vmatpush3.msra.mxu1 %v4773_v15  ;;  %3733 = vmatprep.subr.mxu0 %v5321_v61  ;;  %v5323_v15 = vld [vmem:[#allocation20_spill] sm:$0xff] }
 0x294   : > { %3779 = vmatprep.subr.mxu1 %v4775_v63  ;;  %3734 = vmatpush3.msra.mxu0 %v5321_v61 }
 0x295   : > { %3780 = vmatpush3.msra.mxu1 %v4775_v63  ;;  %3691 = vmatmul.mubr.f32.gmra.mxu0 %v4995_v29  ;;  %v5324_v63 = vld [vmem:[#allocation2_spill] sm:$0xff] }
 0x296   : > { %3735 = vmatprep.subr.mxu0 %v5322_v50  ;;  %3781 = vmatprep.subr.mxu1 %v4826_v54 }
 0x297   : > { %3736 = vmatpush3.msra.mxu0 %v5322_v50  ;;  %3763 = vmatprep.mubr.f32.mxu0 %v4985_v1 }
 0x298   : > { %3782 = vmatpush3.msra.mxu1 %v4826_v54  ;;  %3737 = vmatprep.subr.mxu0 %v5323_v15  ;;  %v5329_v54 = vld [vmem:[#allocation7_spill] sm:$0xff] }
 0x299   : > { %3783 = vmatprep.subr.mxu1 %v4836_v27  ;;  %3738 = vmatpush3.msra.mxu0 %v5323_v15 }
 0x29a   : > { %3784 = vmatpush3.msra.mxu1 %v4836_v27  ;;  %3739 = vmatprep.subr.mxu0 %v5324_v63  ;;  %v5331_v27 = vld [vmem:[#allocation9_spill] sm:$0xff] }
 0x29b   : > { %3785 = vmatprep.subr.mxu1 %v4849_v9  ;;  %3740 = vmatpush3.msra.mxu0 %v5324_v63 }
 0x29c   : > { %3786 = vmatpush3.msra.mxu1 %v4849_v9  ;;  %3741 = vmatprep.subr.mxu0 %v5325_v32  ;;  %v5333_v9 = vld [vmem:[#allocation12_spill] sm:$0xff] }
 0x29d   : > { %3787 = vmatprep.subr.mxu1 %v4864_v24  ;;  %3742 = vmatpush3.msra.mxu0 %v5325_v32 }
 0x29e   : > { %3788 = vmatpush3.msra.mxu1 %v4864_v24  ;;  %3743 = vmatprep.subr.mxu0 %v5326_v31  ;;  %v5335_v24 = vld [vmem:[#allocation19_spill] sm:$0xff] }
 0x29f   : > { %3789 = vmatprep.subr.mxu1 %v4880_v6  ;;  %3744 = vmatpush3.msra.mxu0 %v5326_v31 }
 0x2a0   : > { %3790 = vmatpush3.msra.mxu1 %v4880_v6  ;;  %3745 = vmatprep.subr.mxu0 %v5327_v37 }
 0x2a1   : > { %3791 = vmatprep.subr.mxu1 %v4891_v44  ;;  %3746 = vmatpush3.msra.mxu0 %v5327_v37 }
 0x2a2   : > { %3792 = vmatpush3.msra.mxu1 %v4891_v44  ;;  %3747 = vmatprep.subr.mxu0 %v5328_v16 }
 0x2a3   : > { %3793 = vmatprep.subr.mxu1 %v4905_v60  ;;  %3748 = vmatpush3.msra.mxu0 %v5328_v16 }
 0x2a4   : > { %3794 = vmatpush3.msra.mxu1 %v4905_v60  ;;  %3749 = vmatprep.subr.mxu0 %v5329_v54 }
 0x2a5   : > { %3795 = vmatprep.subr.mxu1 %v4921_v28  ;;  %3750 = vmatpush3.msra.mxu0 %v5329_v54 }
 0x2a6   : > { %3796 = vmatpush3.msra.mxu1 %v4921_v28  ;;  %3751 = vmatprep.subr.mxu0 %v5330_v3 }
 0x2a7   : > { %3797 = vmatprep.subr.mxu1 %v4938_v59  ;;  %3752 = vmatpush3.msra.mxu0 %v5330_v3 }
 0x2a8   : > { %3798 = vmatpush3.msra.mxu1 %v4938_v59  ;;  %3753 = vmatprep.subr.mxu0 %v5331_v27 }
 0x2a9   : > { %3799 = vmatprep.subr.mxu1 %v4954_v23  ;;  %3754 = vmatpush3.msra.mxu0 %v5331_v27 }
 0x2aa   : > { %3800 = vmatpush3.msra.mxu1 %v4954_v23  ;;  %3755 = vmatprep.subr.mxu0 %v5332_v25 }
 0x2ab   : > { %3802 = vmatmul.mubr.f32.vlgmr.msra.gmra.mxu1 %v4980_v42  ;;  %3756 = vmatpush3.msra.mxu0 %v5332_v25 }
 0x2ac   : > { %3804 = vmatprep.mubr.f32.mxu1 %v4998_v34  ;;  %3757 = vmatprep.subr.mxu0 %v5333_v9 }
 0x2ad   : > { %3758 = vmatpush3.msra.mxu0 %v5333_v9 }
 0x2ae   : > { %3759 = vmatprep.subr.mxu0 %v5334_v10 }
 0x2af   : > { %3805 = vmatmul.mubr.f32.gmra.mxu1 %v4989_v45  ;;  %3760 = vmatpush3.msra.mxu0 %v5334_v10 }
 0x2b0   : > { %3761 = vmatprep.subr.mxu0 %v5335_v24 }
 0x2b1   : > { %3762 = vmatpush3.msra.mxu0 %v5335_v24 }
 0x2b2   : > { %3764 = vmatmul.mubr.f32.vlgmr.msra.gmra.mxu0 %v4980_v42 }
 0x2b3   : > { %3766 = vmatprep.mubr.f32.mxu0 %v4998_v34 }
 0x2b6   : > { %3767 = vmatmul.mubr.f32.gmra.mxu0 %v4989_v45 }
 0x324   : > { %v3651_v58 = vpop.f32.mrf.mxu1 }
 0x326   : > { %v2187_v6 = vpop.f32.mrf.mxu1 }
 0x329   : > { %v3654_v0 = vpop.f32.mrf.mxu1 }
 0x32b   : > { %v2199_v60 = vpop.f32.mrf.mxu1 }
 0x32d   : > { %v3613_v44 = vpop.f32.mrf.mxu0 }
 0x32e   : > { %v2017_v14 = vadd.f32 %v3613_v44, %v2760_v12 }
 0x32f   : > { %v2006_v53 = vpop.f32.mrf.mxu0 }
 0x330   : > { %v2007_v41 = vadd.f32 %v2760_v12, %v2006_v53  ;;  %v2194_v38 = vadd.f32 %v3651_v58, %v2017_v14 }
 0x332   : > { %v3616_v43 = vpop.f32.mrf.mxu0  ;;  %v2188_v48 = vadd.f32 %v2187_v6, %v2007_v41 }
 0x333   : > { %v2037_v33 = vadd.f32 %v3616_v43, %v2760_v12 }
 0x334   : > { %v2026_v59 = vpop.f32.mrf.mxu0 }
 0x335   : > { %v2027_v5 = vadd.f32 %v2760_v12, %v2026_v59  ;;  %v2206_v20 = vadd.f32 %v3654_v0, %v2037_v33 }
 0x337   : > { %v2200_v56 = vadd.f32 %v2199_v60, %v2027_v5 }
 0x347   : > { %v3727_v28 = vpop.f32.mrf.mxu1 }
 0x349   : > { %v2419_v23 = vpop.f32.mrf.mxu1 }
 0x34c   : > { %v3730_v22 = vpop.f32.mrf.mxu1 }
 0x34e   : > { %v2435_v42 = vpop.f32.mrf.mxu1 }
 0x350   : > { %v3689_v49 = vpop.f32.mrf.mxu0 }
 0x351   : > { %v2317_v47 = vadd.f32 %v3689_v49, %v2194_v38 }
 0x352   : > { %v2309_v4 = vpop.f32.mrf.mxu0 }
 0x353   : > { %v2310_v1 = vadd.f32 %v2309_v4, %v2188_v48  ;;  %v2428_v55 = vadd.f32 %v3727_v28, %v2317_v47 }
 0x355   : > { %v3692_v62 = vpop.f32.mrf.mxu0  ;;  %v2420_v39 = vadd.f32 %v2419_v23, %v2310_v1 }
 0x356   : > { %v2331_v45 = vadd.f32 %v3692_v62, %v2206_v20 }
 0x357   : > { %v2323_v51 = vpop.f32.mrf.mxu0 }
 0x358   : > { %v2324_v34 = vadd.f32 %v2323_v51, %v2200_v56  ;;  %v2444_v40 = vadd.f32 %v3730_v22, %v2331_v45 }
 0x35a   : > { %v2436_v35 = vadd.f32 %v2435_v42, %v2324_v34 }
 0x36b   : > { %v3803_v30 = vpop.f32.mrf.mxu1 }
 0x36d   : > { %v2667_v57 = vpop.f32.mrf.mxu1 }
 0x36f   : > { %v3806_v19 = vpop.f32.mrf.mxu1 }
 0x371   : > { %v2679_v21 = vpop.f32.mrf.mxu1 }
 0x372   : > { %v3765_v29 = vpop.f32.mrf.mxu0 }
 0x373   : > { %v2569_v8 = vadd.f32 %v3765_v29, %v2428_v55 }
 0x374   : > { %v2562_v2 = vpop.f32.mrf.mxu0 }
 0x375   : > { %v2563_v17 = vadd.f32 %v2562_v2, %v2420_v39  ;;  %v2674_v13 = vadd.f32 %v3803_v30, %v2569_v8 }
 0x376   : > { %v3768_v18 = vpop.f32.mrf.mxu0 }
 0x377   : > { %v2668_v36 = vadd.f32 %v2667_v57, %v2563_v17  ;;  %v2581_v52 = vadd.f32 %v3768_v18, %v2444_v40  ;;  %2690 = vst [vmem:[%s280_s11 + $0x8] sm:$0xff] %v2674_v13 }
 0x378   : > { %v2574_v7 = vpop.f32.mrf.mxu0 }
 0x379   : > { %2689 = vst [vmem:[%s280_s11] sm:$0xff] %v2668_v36  ;;  %v2575_v11 = vadd.f32 %v2574_v7, %v2436_v35  ;;  %v2686_v26 = vadd.f32 %v3806_v19, %v2581_v52 }
 0x37b   : > { %v2680_v46 = vadd.f32 %v2679_v21, %v2575_v11  ;;  %2692 = vst [vmem:[%s280_s11 + $0x18] sm:$0xff] %v2686_v26 }
 0x37d   : > { %2691 = vst [vmem:[%s280_s11 + $0x10] sm:$0xff] %v2680_v46 }
 0x37e PF: > { %s17_s24 = sadd.s32 1, %s3821_s24  }
 0x37f   : > { %p14_p4 = scmp.ge.s32.totalorder %s17_s24, 4  }
 0x381   :  { %16 = sbr.rel (!%p14_p4) target bundleno = 1 (0x1), region = 78 }

</bundles_post_ra>
